<compile_context>
chip_gen: v6e
topology: v6e:2x2x1
jax: 0.10.0
libtpu: 0.0.40
codegen_flags: <defaults>
</compile_context>

<pallas_src>
import functools

import jax
import jax.numpy as jnp
from jax.experimental import pallas as pl
from jax.experimental.pallas import tpu as pltpu


def _round_up(x, m):
    return (x + m - 1) // m * m


def _postnet_kernel(x_ref, *refs, K, T, L, pad, halo, cins):
    """Fused PostNet forward for one batch element (channels-last).

    x_ref:   (1, T + 2*halo, Cin0p)  bf16  — zero T-halo + zero channel padding
    refs:    L weight refs (K*Cin_lp, Cout_lp) bf16  (BN scale folded in, tap-major rows),
             L shift refs  (1, Cout_lp)        f32   (folded BN shift incl. conv bias),
             o_ref (1, T, CoutLp) bf16,
             then 0..2 VMEM ping-pong scratch buffers (Tp, Cp) bf16.
    """
    w_refs = refs[:L]
    s_refs = refs[L:2 * L]
    o_ref = refs[2 * L]
    bufs = refs[2 * L + 1:]

    base = halo - pad          # first tap's row offset
    tail = halo + T

    # Zero only the halo rows of the scratch buffers, once.  Their center rows are
    # fully overwritten every layer, and padded channels come out exactly zero
    # (zero weight columns, zero shift, tanh(0) == 0).
    for buf in bufs:
        cw = buf.shape[-1]
        buf[0:halo, :] = jnp.zeros((halo, cw), buf.dtype)
        buf[tail:tail + halo, :] = jnp.zeros((halo, cw), buf.dtype)

    for l in range(L):                     # L is small & static -> fully unrolled
        cin = cins[l]
        w = w_refs[l]
        if l == 0:
            # Layer 0 reads the (zero-padded) input block directly.
            taps = [x_ref[0, base + k: base + k + T, :] for k in range(K)]
        else:
            src = bufs[(l - 1) % 2]
            taps = [src[base + k: base + k + T, :] for k in range(K)]

        # K accumulating MXU matmuls (no materialized im2col slab).
        acc = jnp.dot(taps[0], w[0:cin, :], preferred_element_type=jnp.float32)
        for k in range(1, K):
            acc = acc + jnp.dot(taps[k], w[k * cin:(k + 1) * cin, :],
                                preferred_element_type=jnp.float32)

        y = acc + s_refs[l][...]           # folded BN scale/shift (+ conv bias)
        if l < L - 1:
            y = jnp.tanh(y)                # EUP transcendental
            dst = bufs[l % 2]
            dst[halo:tail, :] = y.astype(dst.dtype)   # 16-row-aligned center write
        else:
            o_ref[0, :, :] = y.astype(o_ref.dtype)    # last layer: no activation
    # TODO(synk): dropout is identity in eval mode; training-mode dropout not implemented.
    # TODO(synk): at real Tacotron sizes (T ~ 1k) add a T-tile "parallel" grid axis
    # (with an L*pad halo) and/or chunk the acc+tanh chain over T to bound spills on v7x.


def make_postnet_params(key, n_mels, n_conv_layers, n_conv_filters, conv_filter_size):
    """Deterministic synthetic parameters matching the PyTorch module's shapes."""
    conv_filters = [n_mels] + [n_conv_filters] * (n_conv_layers - 1) + [n_mels]
    params = []
    for cin, cout in zip(conv_filters, conv_filters[1:]):
        key, k_w, k_b, k_g, k_be, k_m, k_v = jax.random.split(key, 7)
        # PyTorch Conv1d weight layout: [Cout, Cin, K]
        w = jax.random.normal(k_w, (cout, cin, conv_filter_size), jnp.float32) * 0.1
        b = jax.random.normal(k_b, (cout,), jnp.float32) * 0.1
        gamma = 1.0 + 0.1 * jax.random.normal(k_g, (cout,), jnp.float32)
        beta = 0.1 * jax.random.normal(k_be, (cout,), jnp.float32)
        mean = 0.1 * jax.random.normal(k_m, (cout,), jnp.float32)
        var = jax.nn.softplus(jax.random.normal(k_v, (cout,), jnp.float32)) + 0.5
        params.append((w, b, gamma, beta, mean, var))
    return params


def prepare_kernel_params(raw_params, cins, couts):
    """Fold conv bias + BatchNorm1d (eval) into the weights / a shift vector in f32,
    zero-pad channels to the per-layer padded widths, lay out rows tap-major, and
    cast weights to bf16 only at the very end (keeps the BN fold in f32)."""
    eps = 1e-5
    w_list, shift_list = [], []
    for (w, b, gamma, beta, mean, var), cin_p, cout_p in zip(raw_params, cins, couts):
        cout, cin, K = w.shape
        scale = gamma / jnp.sqrt(var + eps)
        shift = scale * (b - mean) + beta
        w_scaled = w * scale[:, None, None]              # BN scale folded into conv (f32)
        w_tap = jnp.transpose(w_scaled, (2, 1, 0))       # (K, Cin, Cout), tap-major
        w_pad = jnp.zeros((K, cin_p, cout_p), jnp.float32).at[:, :cin, :cout].set(w_tap)
        w_list.append(w_pad.reshape(K * cin_p, cout_p).astype(jnp.bfloat16))
        shift_list.append(jnp.zeros((1, cout_p), jnp.float32).at[0, :cout].set(shift))
    return w_list, shift_list


def _pick_vmem_limit():
    # ~75% of per-core physical VMEM: ~96 MiB on v5e/v6e (128 MiB), ~48 MiB on v7x (64 MiB).
    try:
        cap = pltpu.get_tpu_info().vmem_capacity_bytes
        return min(int(cap * 3 // 4), 100 * 1024 * 1024)
    except Exception:
        return 48 * 1024 * 1024     # safe default on every current generation


def postnet_forward(x_bct, raw_params):
    """x_bct: [B, n_mels, T] -> [B, n_mels, T] (PyTorch layout)."""
    B, n_mels, T = x_bct.shape
    K = raw_params[0][0].shape[-1]
    L = len(raw_params)
    pad = (K - 1) // 2                    # 'same' padding (asymmetric for even K)
    halo = _round_up(max(pad, 16), 16)    # bf16 sublane tile (16 rows): unmasked writes
    Tp = T + 2 * halo

    # Per-layer padded channel widths (first-layer Cin / last-layer Cout stay narrow).
    cins = tuple(_round_up(w.shape[1], 128) for (w, *_r) in raw_params)
    couts = tuple(_round_up(w.shape[0], 128) for (w, *_r) in raw_params)
    assert all(cins[l] == couts[l - 1] for l in range(1, L))
    Cin0p, CoutLp = cins[0], couts[-1]
    buf_w = couts[0]                      # intermediate activation width (padded filters)
    n_bufs = min(max(L - 1, 0), 2)        # ping-pong buffers actually needed

    w_list, shift_list = prepare_kernel_params(raw_params, cins, couts)

    # Channels-last + a single zero pad (halo + channel) for the whole fused stack.
    x = jnp.transpose(x_bct, (0, 2, 1))                                    # (B, T, C)
    x = jnp.pad(x, ((0, 0), (halo, halo), (0, Cin0p - n_mels))).astype(jnp.bfloat16)

    kernel = functools.partial(_postnet_kernel, K=K, T=T, L=L, pad=pad,
                               halo=halo, cins=cins)

    def _const_spec(shape):
        # Grid-invariant input: single-buffer it (double-buffering is pure VMEM waste).
        return pl.BlockSpec(shape, lambda b: (0,) * len(shape),
                            pipeline_mode=pl.Buffered(1))

    in_specs = [pl.BlockSpec((1, Tp, Cin0p), lambda b: (b, 0, 0))]         # activations
    in_specs += [_const_spec(tuple(w.shape)) for w in w_list]              # weights
    in_specs += [_const_spec(tuple(s.shape)) for s in shift_list]          # shifts

    out = pl.pallas_call(
        kernel,
        out_shape=jax.ShapeDtypeStruct((B, T, CoutLp), jnp.bfloat16),      # bf16 writeback
        grid_spec=pltpu.PrefetchScalarGridSpec(
            num_scalar_prefetch=0,
            grid=(B,),
            in_specs=in_specs,
            out_specs=pl.BlockSpec((1, T, CoutLp), lambda b: (b, 0, 0)),
            scratch_shapes=[pltpu.VMEM((Tp, buf_w), jnp.bfloat16)
                            for _ in range(n_bufs)],
        ),
        compiler_params=pltpu.CompilerParams(
            dimension_semantics=("parallel",),      # batch shards across v7x's 2 TCs
            vmem_limit_bytes=_pick_vmem_limit()),
    )(x, *w_list, *shift_list)

    out = out[:, :, :n_mels].astype(jnp.float32)   # drop channel padding, back to f32
    return jnp.transpose(out, (0, 2, 1))           # back to [B, n_mels, T]


def postnet_reference(x_bct, raw_params):
    """Pure-JAX f32 reference (same math as the PyTorch module in eval mode)."""
    eps = 1e-5
    x = x_bct
    L = len(raw_params)
    for i, (w, b, gamma, beta, mean, var) in enumerate(raw_params):
        K = w.shape[-1]
        pad = (K - 1) // 2
        y = jax.lax.conv_general_dilated(
            x, w, window_strides=(1,), padding=[(pad, K - 1 - pad)],
            dimension_numbers=("NCH", "OIH", "NCH"))
        y = y + b[None, :, None]
        y = gamma[None, :, None] * (y - mean[None, :, None]) / \
            jnp.sqrt(var[None, :, None] + eps) + beta[None, :, None]
        if i < L - 1:
            y = jnp.tanh(y)
        x = y
    return x


if __name__ == "__main__":
    # Small shapes consistent with the module's forward: x is [B, n_mels, T].
    B, n_mels, T = 2, 16, 32
    n_conv_layers, n_conv_filters, conv_filter_size = 3, 64, 5

    key = jax.random.PRNGKey(0)
    key, kx = jax.random.split(key)
    x = jax.random.normal(kx, (B, n_mels, T), jnp.float32)

    params = make_postnet_params(key, n_mels, n_conv_layers, n_conv_filters,
                                 conv_filter_size)

    out = postnet_forward(x, params)
    out = jax.block_until_ready(out)

    ref = postnet_reference(x, params)
    assert out.shape == (B, n_mels, T)
    err = float(jnp.max(jnp.abs(out - ref)))
    # bf16 MXU inputs / bf16 activations & output (f32 accumulation) -> loose tolerance.
    assert jnp.allclose(out, ref, atol=5e-2, rtol=5e-2), f"max abs err = {err}"

    print("KERNEL_OK")
</pallas_src>

<mosaic_0001>
module attributes {stable_mosaic.version = 11 : i64} {
  func.func @_postnet_kernel(%arg0: i32, %arg1: memref<1x64x128xbf16, #tpu.memory_space<vmem>>, %arg2: memref<640x128xbf16, #tpu.memory_space<vmem>>, %arg3: memref<640x128xbf16, #tpu.memory_space<vmem>>, %arg4: memref<640x128xbf16, #tpu.memory_space<vmem>>, %arg5: memref<1x128xf32, #tpu.memory_space<vmem>>, %arg6: memref<1x128xf32, #tpu.memory_space<vmem>>, %arg7: memref<1x128xf32, #tpu.memory_space<vmem>>, %arg8: memref<1x32x128xbf16, #tpu.memory_space<vmem>>, %arg9: memref<64x128xbf16, #tpu.memory_space<vmem>>, %arg10: memref<64x128xbf16, #tpu.memory_space<vmem>>) attributes {dimension_semantics = [#tpu.dimension_semantics<parallel>], iteration_bounds = array<i64: 2>, scalar_prefetch = 0 : i64, scratch_operands = 2 : i64, tpu.core_type = #tpu.core_type<tc>, window_params = [{transform_indices = @transform_0, window_bounds = array<i64: 1, 64, 128>}, {pipeline_mode = #tpu.pipeline_mode<synchronous>, transform_indices = @transform_1, window_bounds = array<i64: 640, 128>}, {pipeline_mode = #tpu.pipeline_mode<synchronous>, transform_indices = @transform_2, window_bounds = array<i64: 640, 128>}, {pipeline_mode = #tpu.pipeline_mode<synchronous>, transform_indices = @transform_3, window_bounds = array<i64: 640, 128>}, {pipeline_mode = #tpu.pipeline_mode<synchronous>, transform_indices = @transform_4, window_bounds = array<i64: 1, 128>}, {pipeline_mode = #tpu.pipeline_mode<synchronous>, transform_indices = @transform_5, window_bounds = array<i64: 1, 128>}, {pipeline_mode = #tpu.pipeline_mode<synchronous>, transform_indices = @transform_6, window_bounds = array<i64: 1, 128>}, {transform_indices = @transform_7, window_bounds = array<i64: 1, 32, 128>}]} {
    %cst = arith.constant 0.000000e+00 : bf16
    %0 = vector.broadcast %cst : bf16 to vector<16x128xbf16>
    %c0 = arith.constant 0 : index
    %c0_0 = arith.constant 0 : index
    %1 = vector.load %arg9[%c0, %c0_0] : memref<64x128xbf16, #tpu.memory_space<vmem>>, vector<16x128xbf16>
    tpu.vector_store %arg9[%c0, %c0_0], %0 {strides = array<i32>} : memref<64x128xbf16, #tpu.memory_space<vmem>>, vector<16x128xbf16>,
    %cst_1 = arith.constant 0.000000e+00 : bf16
    %2 = vector.broadcast %cst_1 : bf16 to vector<16x128xbf16>
    %c48 = arith.constant 48 : index
    %c0_2 = arith.constant 0 : index
    %3 = vector.load %arg9[%c48, %c0_2] : memref<64x128xbf16, #tpu.memory_space<vmem>>, vector<16x128xbf16>
    tpu.vector_store %arg9[%c48, %c0_2], %2 {strides = array<i32>} : memref<64x128xbf16, #tpu.memory_space<vmem>>, vector<16x128xbf16>,
    %cst_3 = arith.constant 0.000000e+00 : bf16
    %4 = vector.broadcast %cst_3 : bf16 to vector<16x128xbf16>
    %c0_4 = arith.constant 0 : index
    %c0_5 = arith.constant 0 : index
    %5 = vector.load %arg10[%c0_4, %c0_5] : memref<64x128xbf16, #tpu.memory_space<vmem>>, vector<16x128xbf16>
    tpu.vector_store %arg10[%c0_4, %c0_5], %4 {strides = array<i32>} : memref<64x128xbf16, #tpu.memory_space<vmem>>, vector<16x128xbf16>,
    %cst_6 = arith.constant 0.000000e+00 : bf16
    %6 = vector.broadcast %cst_6 : bf16 to vector<16x128xbf16>
    %c48_7 = arith.constant 48 : index
    %c0_8 = arith.constant 0 : index
    %7 = vector.load %arg10[%c48_7, %c0_8] : memref<64x128xbf16, #tpu.memory_space<vmem>>, vector<16x128xbf16>
    tpu.vector_store %arg10[%c48_7, %c0_8], %6 {strides = array<i32>} : memref<64x128xbf16, #tpu.memory_space<vmem>>, vector<16x128xbf16>,
    %c0_9 = arith.constant 0 : index
    %c14 = arith.constant 14 : index
    %c0_10 = arith.constant 0 : index
    %8 = vector.load %arg1[%c0_9, %c14, %c0_10] : memref<1x64x128xbf16, #tpu.memory_space<vmem>>, vector<1x32x128xbf16>
    %9 = vector.shape_cast %8 : vector<1x32x128xbf16> to vector<32x128xbf16>
    %c0_11 = arith.constant 0 : index
    %c15 = arith.constant 15 : index
    %c0_12 = arith.constant 0 : index
    %10 = vector.load %arg1[%c0_11, %c15, %c0_12] : memref<1x64x128xbf16, #tpu.memory_space<vmem>>, vector<1x32x128xbf16>
    %11 = vector.shape_cast %10 : vector<1x32x128xbf16> to vector<32x128xbf16>
    %c0_13 = arith.constant 0 : index
    %c16 = arith.constant 16 : index
    %c0_14 = arith.constant 0 : index
    %12 = vector.load %arg1[%c0_13, %c16, %c0_14] : memref<1x64x128xbf16, #tpu.memory_space<vmem>>, vector<1x32x128xbf16>
    %13 = vector.shape_cast %12 : vector<1x32x128xbf16> to vector<32x128xbf16>
    %c0_15 = arith.constant 0 : index
    %c17 = arith.constant 17 : index
    %c0_16 = arith.constant 0 : index
    %14 = vector.load %arg1[%c0_15, %c17, %c0_16] : memref<1x64x128xbf16, #tpu.memory_space<vmem>>, vector<1x32x128xbf16>
    %15 = vector.shape_cast %14 : vector<1x32x128xbf16> to vector<32x128xbf16>
    %c0_17 = arith.constant 0 : index
    %c18 = arith.constant 18 : index
    %c0_18 = arith.constant 0 : index
    %16 = vector.load %arg1[%c0_17, %c18, %c0_18] : memref<1x64x128xbf16, #tpu.memory_space<vmem>>, vector<1x32x128xbf16>
    %17 = vector.shape_cast %16 : vector<1x32x128xbf16> to vector<32x128xbf16>
    %c0_19 = arith.constant 0 : index
    %c0_20 = arith.constant 0 : index
    %18 = vector.load %arg2[%c0_19, %c0_20] : memref<640x128xbf16, #tpu.memory_space<vmem>>, vector<128x128xbf16>
    %cst_21 = arith.constant dense<0.000000e+00> : vector<32x128xf32>
    %19 = tpu.matmul %9, %18, %cst_21 {dimension_numbers = #tpu.dot_dimension_numbers<[1], [0], [0], [1], [0, 0, 1, 1], [], []>} : vector<32x128xbf16>, vector<128x128xbf16>, vector<32x128xf32> -> vector<32x128xf32>
    %c128 = arith.constant 128 : index
    %c0_22 = arith.constant 0 : index
    %20 = vector.load %arg2[%c128, %c0_22] : memref<640x128xbf16, #tpu.memory_space<vmem>>, vector<128x128xbf16>
    %cst_23 = arith.constant dense<0.000000e+00> : vector<32x128xf32>
    %21 = tpu.matmul %11, %20, %cst_23 {dimension_numbers = #tpu.dot_dimension_numbers<[1], [0], [0], [1], [0, 0, 1, 1], [], []>} : vector<32x128xbf16>, vector<128x128xbf16>, vector<32x128xf32> -> vector<32x128xf32>
    %22 = arith.addf %19, %21 : vector<32x128xf32>
    %c256 = arith.constant 256 : index
    %c0_24 = arith.constant 0 : index
    %23 = vector.load %arg2[%c256, %c0_24] : memref<640x128xbf16, #tpu.memory_space<vmem>>, vector<128x128xbf16>
    %cst_25 = arith.constant dense<0.000000e+00> : vector<32x128xf32>
    %24 = tpu.matmul %13, %23, %cst_25 {dimension_numbers = #tpu.dot_dimension_numbers<[1], [0], [0], [1], [0, 0, 1, 1], [], []>} : vector<32x128xbf16>, vector<128x128xbf16>, vector<32x128xf32> -> vector<32x128xf32>
    %25 = arith.addf %22, %24 : vector<32x128xf32>
    %c384 = arith.constant 384 : index
    %c0_26 = arith.constant 0 : index
    %26 = vector.load %arg2[%c384, %c0_26] : memref<640x128xbf16, #tpu.memory_space<vmem>>, vector<128x128xbf16>
    %cst_27 = arith.constant dense<0.000000e+00> : vector<32x128xf32>
    %27 = tpu.matmul %15, %26, %cst_27 {dimension_numbers = #tpu.dot_dimension_numbers<[1], [0], [0], [1], [0, 0, 1, 1], [], []>} : vector<32x128xbf16>, vector<128x128xbf16>, vector<32x128xf32> -> vector<32x128xf32>
    %28 = arith.addf %25, %27 : vector<32x128xf32>
    %c512 = arith.constant 512 : index
    %c0_28 = arith.constant 0 : index
    %29 = vector.load %arg2[%c512, %c0_28] : memref<640x128xbf16, #tpu.memory_space<vmem>>, vector<128x128xbf16>
    %cst_29 = arith.constant dense<0.000000e+00> : vector<32x128xf32>
    %30 = tpu.matmul %17, %29, %cst_29 {dimension_numbers = #tpu.dot_dimension_numbers<[1], [0], [0], [1], [0, 0, 1, 1], [], []>} : vector<32x128xbf16>, vector<128x128xbf16>, vector<32x128xf32> -> vector<32x128xf32>
    %31 = arith.addf %28, %30 : vector<32x128xf32>
    %c0_30 = arith.constant 0 : index
    %c0_31 = arith.constant 0 : index
    %32 = vector.load %arg5[%c0_30, %c0_31] : memref<1x128xf32, #tpu.memory_space<vmem>>, vector<1x128xf32>
    %33 = vector.broadcast %32 : vector<1x128xf32> to vector<32x128xf32>
    %34 = arith.addf %31, %33 : vector<32x128xf32>
    %35 = math.tanh %34 : vector<32x128xf32>
    %36 = arith.truncf %35 : vector<32x128xf32> to vector<32x128xbf16>
    %c16_32 = arith.constant 16 : index
    %c0_33 = arith.constant 0 : index
    %37 = vector.load %arg9[%c16_32, %c0_33] : memref<64x128xbf16, #tpu.memory_space<vmem>>, vector<32x128xbf16>
    tpu.vector_store %arg9[%c16_32, %c0_33], %36 {strides = array<i32>} : memref<64x128xbf16, #tpu.memory_space<vmem>>, vector<32x128xbf16>,
    %c14_34 = arith.constant 14 : index
    %c0_35 = arith.constant 0 : index
    %38 = vector.load %arg9[%c14_34, %c0_35] : memref<64x128xbf16, #tpu.memory_space<vmem>>, vector<32x128xbf16>
    %c15_36 = arith.constant 15 : index
    %c0_37 = arith.constant 0 : index
    %39 = vector.load %arg9[%c15_36, %c0_37] : memref<64x128xbf16, #tpu.memory_space<vmem>>, vector<32x128xbf16>
    %c16_38 = arith.constant 16 : index
    %c0_39 = arith.constant 0 : index
    %40 = vector.load %arg9[%c16_38, %c0_39] : memref<64x128xbf16, #tpu.memory_space<vmem>>, vector<32x128xbf16>
    %c17_40 = arith.constant 17 : index
    %c0_41 = arith.constant 0 : index
    %41 = vector.load %arg9[%c17_40, %c0_41] : memref<64x128xbf16, #tpu.memory_space<vmem>>, vector<32x128xbf16>
    %c18_42 = arith.constant 18 : index
    %c0_43 = arith.constant 0 : index
    %42 = vector.load %arg9[%c18_42, %c0_43] : memref<64x128xbf16, #tpu.memory_space<vmem>>, vector<32x128xbf16>
    %c0_44 = arith.constant 0 : index
    %c0_45 = arith.constant 0 : index
    %43 = vector.load %arg3[%c0_44, %c0_45] : memref<640x128xbf16, #tpu.memory_space<vmem>>, vector<128x128xbf16>
    %cst_46 = arith.constant dense<0.000000e+00> : vector<32x128xf32>
    %44 = tpu.matmul %38, %43, %cst_46 {dimension_numbers = #tpu.dot_dimension_numbers<[1], [0], [0], [1], [0, 0, 1, 1], [], []>} : vector<32x128xbf16>, vector<128x128xbf16>, vector<32x128xf32> -> vector<32x128xf32>
    %c128_47 = arith.constant 128 : index
    %c0_48 = arith.constant 0 : index
    %45 = vector.load %arg3[%c128_47, %c0_48] : memref<640x128xbf16, #tpu.memory_space<vmem>>, vector<128x128xbf16>
    %cst_49 = arith.constant dense<0.000000e+00> : vector<32x128xf32>
    %46 = tpu.matmul %39, %45, %cst_49 {dimension_numbers = #tpu.dot_dimension_numbers<[1], [0], [0], [1], [0, 0, 1, 1], [], []>} : vector<32x128xbf16>, vector<128x128xbf16>, vector<32x128xf32> -> vector<32x128xf32>
    %47 = arith.addf %44, %46 : vector<32x128xf32>
    %c256_50 = arith.constant 256 : index
    %c0_51 = arith.constant 0 : index
    %48 = vector.load %arg3[%c256_50, %c0_51] : memref<640x128xbf16, #tpu.memory_space<vmem>>, vector<128x128xbf16>
    %cst_52 = arith.constant dense<0.000000e+00> : vector<32x128xf32>
    %49 = tpu.matmul %40, %48, %cst_52 {dimension_numbers = #tpu.dot_dimension_numbers<[1], [0], [0], [1], [0, 0, 1, 1], [], []>} : vector<32x128xbf16>, vector<128x128xbf16>, vector<32x128xf32> -> vector<32x128xf32>
    %50 = arith.addf %47, %49 : vector<32x128xf32>
    %c384_53 = arith.constant 384 : index
    %c0_54 = arith.constant 0 : index
    %51 = vector.load %arg3[%c384_53, %c0_54] : memref<640x128xbf16, #tpu.memory_space<vmem>>, vector<128x128xbf16>
    %cst_55 = arith.constant dense<0.000000e+00> : vector<32x128xf32>
    %52 = tpu.matmul %41, %51, %cst_55 {dimension_numbers = #tpu.dot_dimension_numbers<[1], [0], [0], [1], [0, 0, 1, 1], [], []>} : vector<32x128xbf16>, vector<128x128xbf16>, vector<32x128xf32> -> vector<32x128xf32>
    %53 = arith.addf %50, %52 : vector<32x128xf32>
    %c512_56 = arith.constant 512 : index
    %c0_57 = arith.constant 0 : index
    %54 = vector.load %arg3[%c512_56, %c0_57] : memref<640x128xbf16, #tpu.memory_space<vmem>>, vector<128x128xbf16>
    %cst_58 = arith.constant dense<0.000000e+00> : vector<32x128xf32>
    %55 = tpu.matmul %42, %54, %cst_58 {dimension_numbers = #tpu.dot_dimension_numbers<[1], [0], [0], [1], [0, 0, 1, 1], [], []>} : vector<32x128xbf16>, vector<128x128xbf16>, vector<32x128xf32> -> vector<32x128xf32>
    %56 = arith.addf %53, %55 : vector<32x128xf32>
    %c0_59 = arith.constant 0 : index
    %c0_60 = arith.constant 0 : index
    %57 = vector.load %arg6[%c0_59, %c0_60] : memref<1x128xf32, #tpu.memory_space<vmem>>, vector<1x128xf32>
    %58 = vector.broadcast %57 : vector<1x128xf32> to vector<32x128xf32>
    %59 = arith.addf %56, %58 : vector<32x128xf32>
    %60 = math.tanh %59 : vector<32x128xf32>
    %61 = arith.truncf %60 : vector<32x128xf32> to vector<32x128xbf16>
    %c16_61 = arith.constant 16 : index
    %c0_62 = arith.constant 0 : index
    %62 = vector.load %arg10[%c16_61, %c0_62] : memref<64x128xbf16, #tpu.memory_space<vmem>>, vector<32x128xbf16>
    tpu.vector_store %arg10[%c16_61, %c0_62], %61 {strides = array<i32>} : memref<64x128xbf16, #tpu.memory_space<vmem>>, vector<32x128xbf16>,
    %c14_63 = arith.constant 14 : index
    %c0_64 = arith.constant 0 : index
    %63 = vector.load %arg10[%c14_63, %c0_64] : memref<64x128xbf16, #tpu.memory_space<vmem>>, vector<32x128xbf16>
    %c15_65 = arith.constant 15 : index
    %c0_66 = arith.constant 0 : index
    %64 = vector.load %arg10[%c15_65, %c0_66] : memref<64x128xbf16, #tpu.memory_space<vmem>>, vector<32x128xbf16>
    %c16_67 = arith.constant 16 : index
    %c0_68 = arith.constant 0 : index
    %65 = vector.load %arg10[%c16_67, %c0_68] : memref<64x128xbf16, #tpu.memory_space<vmem>>, vector<32x128xbf16>
    %c17_69 = arith.constant 17 : index
    %c0_70 = arith.constant 0 : index
    %66 = vector.load %arg10[%c17_69, %c0_70] : memref<64x128xbf16, #tpu.memory_space<vmem>>, vector<32x128xbf16>
    %c18_71 = arith.constant 18 : index
    %c0_72 = arith.constant 0 : index
    %67 = vector.load %arg10[%c18_71, %c0_72] : memref<64x128xbf16, #tpu.memory_space<vmem>>, vector<32x128xbf16>
    %c0_73 = arith.constant 0 : index
    %c0_74 = arith.constant 0 : index
    %68 = vector.load %arg4[%c0_73, %c0_74] : memref<640x128xbf16, #tpu.memory_space<vmem>>, vector<128x128xbf16>
    %cst_75 = arith.constant dense<0.000000e+00> : vector<32x128xf32>
    %69 = tpu.matmul %63, %68, %cst_75 {dimension_numbers = #tpu.dot_dimension_numbers<[1], [0], [0], [1], [0, 0, 1, 1], [], []>} : vector<32x128xbf16>, vector<128x128xbf16>, vector<32x128xf32> -> vector<32x128xf32>
    %c128_76 = arith.constant 128 : index
    %c0_77 = arith.constant 0 : index
    %70 = vector.load %arg4[%c128_76, %c0_77] : memref<640x128xbf16, #tpu.memory_space<vmem>>, vector<128x128xbf16>
    %cst_78 = arith.constant dense<0.000000e+00> : vector<32x128xf32>
    %71 = tpu.matmul %64, %70, %cst_78 {dimension_numbers = #tpu.dot_dimension_numbers<[1], [0], [0], [1], [0, 0, 1, 1], [], []>} : vector<32x128xbf16>, vector<128x128xbf16>, vector<32x128xf32> -> vector<32x128xf32>
    %72 = arith.addf %69, %71 : vector<32x128xf32>
    %c256_79 = arith.constant 256 : index
    %c0_80 = arith.constant 0 : index
    %73 = vector.load %arg4[%c256_79, %c0_80] : memref<640x128xbf16, #tpu.memory_space<vmem>>, vector<128x128xbf16>
    %cst_81 = arith.constant dense<0.000000e+00> : vector<32x128xf32>
    %74 = tpu.matmul %65, %73, %cst_81 {dimension_numbers = #tpu.dot_dimension_numbers<[1], [0], [0], [1], [0, 0, 1, 1], [], []>} : vector<32x128xbf16>, vector<128x128xbf16>, vector<32x128xf32> -> vector<32x128xf32>
    %75 = arith.addf %72, %74 : vector<32x128xf32>
    %c384_82 = arith.constant 384 : index
    %c0_83 = arith.constant 0 : index
    %76 = vector.load %arg4[%c384_82, %c0_83] : memref<640x128xbf16, #tpu.memory_space<vmem>>, vector<128x128xbf16>
    %cst_84 = arith.constant dense<0.000000e+00> : vector<32x128xf32>
    %77 = tpu.matmul %66, %76, %cst_84 {dimension_numbers = #tpu.dot_dimension_numbers<[1], [0], [0], [1], [0, 0, 1, 1], [], []>} : vector<32x128xbf16>, vector<128x128xbf16>, vector<32x128xf32> -> vector<32x128xf32>
    %78 = arith.addf %75, %77 : vector<32x128xf32>
    %c512_85 = arith.constant 512 : index
    %c0_86 = arith.constant 0 : index
    %79 = vector.load %arg4[%c512_85, %c0_86] : memref<640x128xbf16, #tpu.memory_space<vmem>>, vector<128x128xbf16>
    %cst_87 = arith.constant dense<0.000000e+00> : vector<32x128xf32>
    %80 = tpu.matmul %67, %79, %cst_87 {dimension_numbers = #tpu.dot_dimension_numbers<[1], [0], [0], [1], [0, 0, 1, 1], [], []>} : vector<32x128xbf16>, vector<128x128xbf16>, vector<32x128xf32> -> vector<32x128xf32>
    %81 = arith.addf %78, %80 : vector<32x128xf32>
    %c0_88 = arith.constant 0 : index
    %c0_89 = arith.constant 0 : index
    %82 = vector.load %arg7[%c0_88, %c0_89] : memref<1x128xf32, #tpu.memory_space<vmem>>, vector<1x128xf32>
    %83 = vector.broadcast %82 : vector<1x128xf32> to vector<32x128xf32>
    %84 = arith.addf %81, %83 : vector<32x128xf32>
    %85 = arith.truncf %84 : vector<32x128xf32> to vector<32x128xbf16>
    %c0_90 = arith.constant 0 : index
    %c0_91 = arith.constant 0 : index
    %c0_92 = arith.constant 0 : index
    %86 = vector.load %arg8[%c0_90, %c0_91, %c0_92] : memref<1x32x128xbf16, #tpu.memory_space<vmem>>, vector<1x32x128xbf16>
    %87 = vector.shape_cast %86 : vector<1x32x128xbf16> to vector<32x128xbf16>
    %88 = vector.shape_cast %85 : vector<32x128xbf16> to vector<1x32x128xbf16>
    tpu.vector_store %arg8[%c0_90, %c0_91, %c0_92], %88 {strides = array<i32>} : memref<1x32x128xbf16, #tpu.memory_space<vmem>>, vector<1x32x128xbf16>,
    return
  }
  func.func @transform_0(%arg0: i32) -> (i32, i32, i32) {
    %c0_i32 = arith.constant 0 : i32
    %c0_i32_0 = arith.constant 0 : i32
    %c0_i32_1 = arith.constant 0 : i32
    return %arg0, %c0_i32, %c0_i32_0 : i32, i32, i32
  }
  func.func @transform_1(%arg0: i32) -> (i32, i32) {
    %c0_i32 = arith.constant 0 : i32
    %c0_i32_0 = arith.constant 0 : i32
    %c0_i32_1 = arith.constant 0 : i32
    return %c0_i32, %c0_i32_0 : i32, i32
  }
  func.func @transform_2(%arg0: i32) -> (i32, i32) {
    %c0_i32 = arith.constant 0 : i32
    %c0_i32_0 = arith.constant 0 : i32
    %c0_i32_1 = arith.constant 0 : i32
    return %c0_i32, %c0_i32_0 : i32, i32
  }
  func.func @transform_3(%arg0: i32) -> (i32, i32) {
    %c0_i32 = arith.constant 0 : i32
    %c0_i32_0 = arith.constant 0 : i32
    %c0_i32_1 = arith.constant 0 : i32
    return %c0_i32, %c0_i32_0 : i32, i32
  }
  func.func @transform_4(%arg0: i32) -> (i32, i32) {
    %c0_i32 = arith.constant 0 : i32
    %c0_i32_0 = arith.constant 0 : i32
    %c0_i32_1 = arith.constant 0 : i32
    return %c0_i32, %c0_i32_0 : i32, i32
  }
  func.func @transform_5(%arg0: i32) -> (i32, i32) {
    %c0_i32 = arith.constant 0 : i32
    %c0_i32_0 = arith.constant 0 : i32
    %c0_i32_1 = arith.constant 0 : i32
    return %c0_i32, %c0_i32_0 : i32, i32
  }
  func.func @transform_6(%arg0: i32) -> (i32, i32) {
    %c0_i32 = arith.constant 0 : i32
    %c0_i32_0 = arith.constant 0 : i32
    %c0_i32_1 = arith.constant 0 : i32
    return %c0_i32, %c0_i32_0 : i32, i32
  }
  func.func @transform_7(%arg0: i32) -> (i32, i32, i32) {
    %c0_i32 = arith.constant 0 : i32
    %c0_i32_0 = arith.constant 0 : i32
    %c0_i32_1 = arith.constant 0 : i32
    return %arg0, %c0_i32, %c0_i32_0 : i32, i32, i32
  }
}

</mosaic_0001>

<bundles_post_ra>
// kernel: tpu_custom_call.1
= control target key start
LH: loop header
LB: loop body
LE: loop exit
PB: predicated region body
PF: predicated region fallthrough
CT: control target
= control target key end

     0   :  { %s4059_s0 = inlined_call_operand.hbm [shape: bf16[2,64,128], index: 0, kind: input, shape index: {}]   ;;  %s4060_s1 = inlined_call_operand.hbm [shape: bf16[640,128], index: 1, kind: input, shape index: {}]   ;;  %s4061_s2 = inlined_call_operand.hbm [shape: bf16[640,128], index: 2, kind: input, shape index: {}]   ;;  %s4062_s3 = inlined_call_operand.hbm [shape: bf16[640,128], index: 3, kind: input, shape index: {}]   ;;  %s4063_s4 = inlined_call_operand.vmem [shape: f32[1,128], index: 4, kind: input, shape index: {}]   ;;  %s4064_s5 = inlined_call_operand.vmem [shape: f32[1,128], index: 5, kind: input, shape index: {}]   ;;  %s4065_s6 = inlined_call_operand.vmem [shape: f32[1,128], index: 6, kind: input, shape index: {}]   ;;  %s4066_s7 = inlined_call_operand.hbm [shape: bf16[2,32,128], index: 7, kind: output, shape index: {}]  }
   0x1   :  { %4073 = sst [smem:[#allocation17_spill]] %s4060_s1 }
   0x2   :  { %12 = vsyncpa [#allocation5], 0 }
   0x3   :  { %14 = vsyncpa [#allocation5 + $0x1], 0 }
   0x4   :  { %15 = vsyncpa [#allocation8], 0 }
   0x5   :  { %16 = vsyncpa [#allocation11], 0 }
   0x6   :  { %17 = vsyncpa [#allocation6], 0 }
   0x7   :  { %19 = vsyncpa [#allocation6 + $0x1], 0  ;;  %s3746_s24 = smov 0   ;;  %s3748_s25 = smov 0  }
   0x8   :  { %s3750_s26 = smov 0   ;;  %s3752_s27 = smov 0  }
   0x9 LB: > { %s3767_s28 = sadd.s32 4294967295, %s3694_s27   ;;  %s2596_s29 = sadd.s32 4294967294, %s3694_s27   ;;  %s3694_s27 = sphi %s3752_s27, %s4095_s27   ;;  %s3690_s26 = sphi %s3750_s26, %s4094_s26   ;;  %s3686_s25 = sphi %s3748_s25, %s4093_s25   ;;  %s3682_s24 = sphi %s3746_s24, %s4092_s24  }
   0xa   : > { %p45_p0 = scmp.ne.s32.totalorder %s3686_s25, %s3682_s24  ;;  %p4067_p1 = scmp.eq.s32.totalorder %s3767_s28, 0 }
   0xb   : > { %p195_p2 = scmp.eq.s32.totalorder %s3767_s28, 1  ;;  %p201_p3 = scmp.eq.s32.totalorder %s2596_s29, 1 }
   0xc   : > { %p3776_p4 = por %p4067_p1, %p45_p0  ;;  %p2597_p5 = scmp.ge.s32.totalorder %s3694_s27, 1 }
   0xd   : > { %p3781_p6 = por %p201_p3, %p45_p0  ;;  %p208_p7 = scmp.lt.s32.totalorder %s3694_s27, 3 }
   0xe   : > { %s4074_s30 = scalar_select %p3776_p4, 1, 0 }
   0xf   : > { %s4075_s8 = scalar_select %p3781_p6, 1, 0 }
  0x10   : > { %p3786_p8 = pnand %p2597_p5, %p208_p7  ;;  %s3696_s10 = smov [#allocation7]  }
  0x11   : > { %s220_s11 = sshll.u32 %s3696_s10, 4  ;;  %s3697_s13 = smov [#allocation9]   ;;  %s221_s11 = int_to_ptr.vmem [resolvable:$true] %s220_s11 }
  0x12   : > { %s4076_s9 = scalar_select %p3786_p8, 1, 0 }
  0x13   : > { %p3290_p9 = pneg %p3786_p8  ;;  %s233_s14 = sshll.u32 %s3697_s13, 4  ;;  %s234_s14 = int_to_ptr.vmem [resolvable:$true] %s233_s14 }
  0x14   : > { %s3698_s15 = smov [#allocation10]   ;;  %s3527_s17 = scalar_lea.vmem %s221_s11, 5120 }
  0x15   : > { %p3795_p11 = pnand %p3290_p9, %p4067_p1  ;;  %s246_s16 = sshll.u32 %s3698_s15, 4  ;;  %s247_s16 = int_to_ptr.vmem [resolvable:$true] %s246_s16 }
  0x16   : > { %p3528_p13 = scmp.ne.s32.totalorder %s221_s11, %s3527_s17  ;;  %p3535_p5 = scmp.lt.s32.totalorder %s221_s11, %s221_s11 }
  0x17   : > { %p3518_p12 = pneg %p3795_p11  ;;  %p3536_p7 = scmp.lt.s32.totalorder %s3527_s17, %s3527_s17 }
  0x19   : > { %p3530_p0 = pnand %p3528_p13, %p3518_p12  ;;  %p3537_p9 = por %p3536_p7, %p3535_p5 }
  0x1b   : > { %p3531_p3 = pneg %p3530_p0 }
  0x1d   : > { %p3538_p10 = pnand %p3537_p9, %p3531_p3 }
  0x1f   : > { %3541 = shalt.err (!%p3538_p10)
}
  0x20   : > { %s4068_s18 = smov 64   ;;  %s4069_s19 = smov 4  }
  0x21   : > { %s4078_s1 = sld [smem:[#allocation17_spill]]  ;;  %s3553_s22 = scalar_lea.vmem %s234_s14, 5120 }
  0x22   : > { %p3554_p13 = scmp.ne.s32.totalorder %s234_s14, %s3553_s22  ;;  %p3561_p3 = scmp.lt.s32.totalorder %s234_s14, %s234_s14 }
  0x23   : > { %p3562_p10 = scmp.lt.s32.totalorder %s3553_s22, %s3553_s22 }
  0x24   : > { %p3556_p0 = pnand %p3554_p13, %p3518_p12 }
  0x25   : > { %p3563_p7 = por %p3562_p10, %p3561_p3 }
  0x26   : > { %p3557_p5 = pneg %p3556_p0 }
  0x27   : > { %3293 = dma.hbm_to_vmem [thread:$0]  (!%p3795_p11), %s4078_s1, 5120, %s221_s11, [#allocation8], %s4068_s18, %s4068_s18, %s4069_s19  }
  0x28   : > { %p3564_p9 = pnand %p3563_p7, %p3557_p5 }
  0x2a   : > { %3567 = shalt.err (!%p3564_p9)
}
  0x2b   : > { %3296 = dma.hbm_to_vmem [thread:$0]  (!%p3795_p11), %s4061_s2, 5120, %s234_s14, [#allocation8], %s4068_s18, %s4068_s18, %s4069_s19  }
  0x2c   : > { %s3579_s10 = scalar_lea.vmem %s247_s16, 5120  ;;  %p3587_p3 = scmp.lt.s32.totalorder %s247_s16, %s247_s16 }
  0x2d   : > { %p3580_p1 = scmp.ne.s32.totalorder %s247_s16, %s3579_s10  ;;  %p3588_p5 = scmp.lt.s32.totalorder %s3579_s10, %s3579_s10 }
  0x2f   : > { %p3582_p13 = pnand %p3580_p1, %p3518_p12  ;;  %p3589_p10 = por %p3588_p5, %p3587_p3 }
  0x31   : > { %p3583_p0 = pneg %p3582_p13 }
  0x33   : > { %p3590_p7 = pnand %p3589_p10, %p3583_p0 }
  0x35   : > { %3593 = shalt.err (!%p3590_p7)
}
  0x36   : > { %3299 = dma.hbm_to_vmem [thread:$0]  (!%p3795_p11), %s4062_s3, 5120, %s247_s16, [#allocation11], %s4068_s18, %s4068_s18, %s4069_s19  }
  0x37   : > { %s3835_s14 = sadd.s32 1, %s3694_s27   ;;  %s32_s15 = sadd.s32 1, %s3690_s26 }
  0x38   : > { %s29_s12 = ssub.s32 %s3694_s27, %s3835_s14  ;;  %p39_p12 = scmp.ne.s32.totalorder %s3690_s26, %s3686_s25 }
  0x39   : > { %p30_p1 = scmp.eq.s32.totalorder %s29_s12, 0  ;;  %p40_p9 = scmp.eq.s32.totalorder %s3694_s27, 0 }
  0x3a   : > { %p3311_p13 = scmp.lt.s32.totalorder %s3694_s27, 2  ;;  %p3849_p3 = por %p195_p2, %p39_p12 }
  0x3b   : > { %s3845_s17 = scalar_select %p30_p1, %s3690_s26, %s32_s15  }
  0x3c   : > { %p41_p0 = por %p40_p9, %p39_p12  ;;  %s269_s21 = sand.u32 1, %s3690_s26  }
  0x3d   : > { %s4079_s20 = scalar_select %p3849_p3, 1, 0 }
  0x3e   : > { %s2775_s22 = sshll.u32 %s3694_s27, 9  ;;  %s2602_s16 = sshll.u32 %s269_s21, 5 }
  0x3f   : > { %s3858_s10 = scalar_lea.hbm %s4059_s0, %s2775_s22  ;;  %s273_s11 = scalar_lea.vmem [#allocation4], %s2602_s16 }
  0x40   : > { %s280_s13 = sshll.u32 %s273_s11, 4  ;;  %p3860_p11 = pnand %p3311_p13, %p41_p0  ;;  %s3864_s13 = int_to_ptr.vmem [resolvable:$true] %s280_s13 }
  0x41   : > { %s3866_s15 = scalar_lea.sflag [#allocation5], %s269_s21  ;;  %s3594_s18 = scalar_lea.hbm %s3858_s10, 512 }
  0x42   : > { %p3595_p2 = scmp.ne.s32.totalorder %s3858_s10, %s3594_s18  ;;  %p3596_p5 = pneg %p3860_p11 }
  0x43   : > { %s3599_s16 = scalar_lea.hbm %s4059_s0, 1024  ;;  %p3600_p1 = scmp.lt.s32.totalorder %s3858_s10, %s4059_s0 }
  0x44   : > { %p3597_p10 = pnand %p3596_p5, %p3595_p2  ;;  %p3601_p12 = scmp.lt.s32.totalorder %s3599_s16, %s3594_s18 }
  0x46   : > { %p3598_p7 = pneg %p3597_p10  ;;  %p3602_p9 = por %p3601_p12, %p3600_p1 }
  0x48   : > { %p3603_p13 = pnand %p3602_p9, %p3598_p7 }
  0x4a   : > { %3606 = shalt.err (!%p3603_p13)
}
  0x4b   : > { %s3607_s21 = scalar_lea.vmem %s3864_s13, 512  ;;  %s3701_s19 = smov [#allocation4]  }
  0x4c   : > { %p3608_p0 = scmp.ne.s32.totalorder %s3864_s13, %s3607_s21  ;;  %s3612_s1 = sshll.u32 %s3701_s19, 4  ;;  %s3613_s1 = int_to_ptr.vmem [resolvable:$false] %s3612_s1 }
  0x4d   : > { %s3614_s22 = scalar_lea.vmem %s3613_s1, 1024  ;;  %p3615_p10 = scmp.lt.s32.totalorder %s3864_s13, %s3613_s1 }
  0x4e   : > { %p3610_p6 = pnand %p3608_p0, %p3596_p5  ;;  %p3616_p3 = scmp.lt.s32.totalorder %s3614_s22, %s3607_s21 }
  0x50   : > { %p3611_p2 = pneg %p3610_p6  ;;  %p3617_p4 = por %p3616_p3, %p3615_p10 }
  0x52   : > { %p3618_p8 = pnand %p3617_p4, %p3611_p2 }
  0x54   : > { %3621 = shalt.err (!%p3618_p8)
}
  0x55   : > { %s4081_s18 = smov 4   ;;  %s4082_s23 = smov 64  }
  0x56   : > { %3303 = dma.hbm_to_vmem [thread:$0]  (!%p3860_p11), %s3858_s10, 512, %s3864_s13, %s3866_s15, %s4082_s23, %s4082_s23, %s4081_s18  }
  0x57   : > { %p4083_p6 = scmp.ne.s32.totalorder %s4076_s9, 0 }
  0x58   : > { %s3893_s19 = sand.u32 (!%p4083_p6), 1, %s3686_s25   ;;  %p4084_p4 = scmp.ne.s32.totalorder (!%p4083_p6), %s4074_s30, 0 }
  0x59   : > { %292 = sbr.rel (%p4083_p6) target bundleno = 1022 (0x3fe), region = 48  ;;  %s2606_s1 = sshll.u32 (!%p4083_p6), %s3893_s19, 5 }
  0x5a   : > { %s295_s16 = scalar_lea.sflag (!%p4083_p6), [#allocation5], %s3893_s19  ;;  %s3897_s29 = scalar_lea.vmem (!%p4083_p6), [#allocation4], %s2606_s1 }
  0x5e   : > { %3665 = dma.done.wait (%p4084_p4), %s295_s16, 512  }
  0x5f   : > { %3667 = vsyncadd (%p4084_p4), %s295_s16, 4294966784  ;;  %p4085_p8 = scmp.eq.s32.totalorder %s3767_s28, 0 }
  0x61   : > { %3669 = dma.done.wait (%p4085_p8), [#allocation8], 10240   ;;  %p4086_p3 = pmov %p4085_p8 }
  0x63   : > { %3671 = vsyncadd (%p4086_p3), [#allocation8], 4294957056  ;;  %p4087_p11 = pmov %p4086_p3 }
  0x64   : > { %p4088_p5 = pmov %p4086_p3 }
  0x65   : > { %3673 = dma.done.wait (%p4087_p11), [#allocation11], 5120  }
  0x66   : > { %3675 = vsyncadd (%p4088_p5), [#allocation11], 4294962176  ;;  %v3356_v0 = vld [vmem:[#allocation7 + $0x78] sm:$0xff]   ;;  %v3358_v2 = vld [vmem:[#allocation7 + $0x70] sm:$0xff]   ;;  %vm403_vm0 = vsmask.f32 4352 }
  0x67   : > { %v3357_v1 = vld [vmem:[#allocation7 + $0x38] sm:$0xff]   ;;  %2974 = vmatprep.subr.bf16.mxu0 %v3356_v0  ;;  %v3359_v3 = vld [vmem:[#allocation7 + $0x30] sm:$0xff]   ;;  %v3360_v4 = vld [vmem:[#allocation7 + $0x68] sm:$0xff]   ;;  %vm532_vm1 = vcmask 1044480   ;;  %vm777_vm2 = vsmask.f32 7424 }
  0x68   : > { %2994 = vmatprep.subr.bf16.mxu1 %v3357_v1  ;;  %2975 = vmatpush3.bf16.msra.mxu0 %v3356_v0  ;;  %v3361_v5 = vld [vmem:[#allocation7 + $0x28] sm:$0xff]   ;;  %v3362_v6 = vld [vmem:[#allocation7 + $0x60] sm:$0xff]   ;;  %v3364_v8 = vld [vmem:[#allocation7 + $0x58] sm:$0xff]   ;;  %vm920_vm3 = vcmask 1046528   ;;  %s2610_s12 = sshll.u32 %s3893_s19, 4  ;;  %s2788_s18 = sshll.u32 %s3767_s28, 8 }
  0x69   : > { %2995 = vmatpush3.bf16.msra.mxu1 %v3357_v1  ;;  %2976 = vmatprep.subr.bf16.mxu0 %v3358_v2  ;;  %v3363_v7 = vld [vmem:[#allocation7 + $0x20] sm:$0xff]   ;;  %v3365_v9 = vld [vmem:[#allocation7 + $0x18] sm:$0xff]   ;;  %v3366_v10 = vld [vmem:[#allocation7 + $0x50] sm:$0xff]   ;;  %s340_s21 = scalar_lea.vmem [#allocation12], %s2610_s12  ;;  %s4016_s16 = scalar_lea.hbm %s4066_s7, %s2788_s18 }
  0x6a   : > { %2996 = vmatprep.subr.bf16.mxu1 %v3359_v3  ;;  %v3367_v11 = vld [vmem:[#allocation7 + $0x10] sm:$0xff]   ;;  %v350_v12 = vld [vmem:[%s3897_s29 + $0x4] sm:$0x8]  ;;  %v351_v13 = vld [vmem:[%s3897_s29 + $0x8] sm:$0xf]  ;;  %s2494_s22 = sshll.u32 %s340_s21, 4  ;;  %s4011_s22 = int_to_ptr.vmem [resolvable:$true] %s2494_s22 }
  0x6b   : > { %v3914_v14 = vld [vmem:[%s3897_s29 + $0xc] sm:$0xf]  ;;  %v353_v15 = vld [vmem:[%s3897_s29 + $0x10] sm:$0xf]  ;;  %v2611_v16 = vcombine.low %v350_v12, %v351_v13  ;;  %v355_v17 = vld [vmem:[%s3897_s29 + $0x14] sm:$0xf] }
  0x6c   : > { %2977 = vmatpush3.bf16.msra.mxu0 %v3358_v2  ;;  %v2612_v18 = vcombine.low %v3914_v14, %v353_v15  ;;  %v2613_v19 = vcombine.low %v355_v17, %v355_v17  ;;  %v3368_v20 = vld [vmem:[#allocation7 + $0x48] sm:$0xff]   ;;  %v2631_v32 = vcombine.low %v351_v13, %v3914_v14  ;;  %v3370_v33 = vld [vmem:[#allocation7 + $0x40] sm:$0xff]   ;;  %v3375_v37 = vld [vmem:[%s3897_s29 + $0x14] ss:$0 sps:$4 sm:$0x77]   ;;  %v3922_v42 = vcombine.low %v353_v15, %v355_v17  ;;  %s3622_s30 = scalar_lea.vmem %s4011_s22, 256 }
  0x6d   : > { %2997 = vmatpush3.bf16.msra.mxu1 %v3359_v3  ;;  %2978 = vmatprep.subr.bf16.mxu0 %v3360_v4  ;;  %v405_v21 = vshrl.u32 %v2611_v16, 16  ;;  %v408_v22 = vshll.u32 %v2611_v16, 16  ;;  %v533_v23 = vrot.slane %v2611_v16, 3  ;;  %v3369_v28 = vld [vmem:[#allocation7 + $0x8] sm:$0xff]   ;;  %v3371_v43 = vld [vmem:[#allocation7] sm:$0xff]   ;;  %v3376_v46 = vld [vmem:[#allocation7 + $0xb8] sm:$0xff]   ;;  %p3623_p7 = scmp.ne.s32.totalorder %s4011_s22, %s3622_s30 }
  0x6e   : > { %2998 = vmatprep.subr.bf16.mxu1 %v3361_v5  ;;  %v413_v24 = vshrl.u32 %v2612_v18, 16  ;;  %v416_v25 = vshll.u32 %v2612_v18, 16  ;;  %v534_v26 = vrot.slane %v2612_v18, 3  ;;  %v422_v27 = vshrl.u32 %v2613_v19, 16  ;;  %v3377_v52 = vld [vmem:[#allocation7 + $0xf8] sm:$0xff]   ;;  %v3378_v57 = vld [vmem:[#allocation7 + $0xb0] sm:$0xff]  }
  0x6f   : > { %v407_v29 = vrot.slane %v405_v21, 3  ;;  %v410_v30 = vrot.slane %v408_v22, 4  ;;  %v425_v31 = vshll.u32 %v2613_v19, 16  ;;  %v781_v44 = vshll.u32 %v2631_v32, 16  ;;  %v3379_v58 = vld [vmem:[#allocation7 + $0xf0] sm:$0xff]   ;;  %v3380_v60 = vld [vmem:[#allocation7 + $0xa8] sm:$0xff]  }
  0x70   : > { %2979 = vmatpush3.bf16.msra.mxu0 %v3360_v4  ;;  %v415_v34 = vrot.slane %v413_v24, 3  ;;  %v418_v35 = vrot.slane %v416_v25, 4  ;;  %v535_v36 = vsel %vm532_vm1, %v533_v23, %v534_v26  ;;  %v424_v39 = vrot.slane %v422_v27, 3  ;;  %v3381_v61 = vld [vmem:[#allocation7 + $0xe8] sm:$0xff]   ;;  %v3382_v63 = vld [vmem:[#allocation7 + $0xa0] sm:$0xff]   ;;  %v3384_v1 = vld [vmem:[#allocation7 + $0x98] sm:$0xff]  }
  0x71   : > { %2999 = vmatpush3.bf16.msra.mxu1 %v3361_v5  ;;  %2980 = vmatprep.subr.bf16.mxu0 %v3362_v6  ;;  %v411_v38 = vor.u32 %v410_v30, %v407_v29  ;;  %v427_v40 = vrot.slane %v425_v31, 4  ;;  %v779_v48 = vshrl.u32 %v2631_v32, 16  ;;  %v783_v49 = vrot.slane %v781_v44, 1  ;;  %v3930_v62 = vld [vmem:[%s3897_s29 + $0x18] ss:$0 sps:$4 sm:$0x11]  }
  0x72   : > { %3000 = vmatprep.subr.bf16.mxu1 %v3363_v7  ;;  %3010 = vmatprep.mubr.bf16.mxu1 %v535_v36  ;;  %v419_v41 = vor.u32 %v418_v35, %v415_v34  ;;  %v536_v50 = vrot.slane %v3375_v37, 3  ;;  %v786_v51 = vshll.u32 %v3922_v42, 16  ;;  %v3383_v0 = vld [vmem:[#allocation7 + $0xe0] sm:$0xff]   ;;  %v790_v2 = vshrl.u32 %v3922_v42, 16  ;;  %v3385_v3 = vld [vmem:[#allocation7 + $0xd8] sm:$0xff]   ;;  %v3388_v13 = vld [vmem:[#allocation7 + $0x88] sm:$0xff]  }
  0x73   : > { %v428_v47 = vor.u32 %v427_v40, %v424_v39  ;;  %v784_v54 = vor.u32 %v783_v49, %v779_v48  ;;  %v922_v4 = vrot.slane %v3922_v42, 1  ;;  %v794_v5 = vshll.u32 %v3930_v62, 16  ;;  %v3389_v15 = vld [vmem:[#allocation7 + $0xc8] sm:$0xff]   ;;  %v3390_v16 = vld [vmem:[#allocation7 + $0x80] sm:$0xff]   ;;  %v3396_v19 = vld [vmem:[#allocation7 + $0x130] sm:$0xff]   ;;  %p4089_p1 = scmp.ne.s32.totalorder %s4079_s20, 0 }
  0x74   : > { %2981 = vmatpush3.bf16.msra.mxu0 %v3362_v6  ;;  %v420_v45 = vsel %vm403_vm0, %v411_v38, %v419_v41  ;;  %v788_v55 = vrot.slane %v786_v51, 1  ;;  %v537_v56 = vsel %vm532_vm1, %v534_v26, %v536_v50  ;;  %v924_v6 = vrot.slane %v3930_v62, 1  ;;  %v3391_v17 = vld [vmem:[#allocation7 + $0xc0] sm:$0xff]   ;;  %v3397_v22 = vld [vmem:[#allocation7 + $0x128] sm:$0xff]   ;;  %v3399_v24 = vld [vmem:[#allocation7 + $0x118] sm:$0xff]   ;;  %s3703_s28 = smov [#allocation12]  }
  0x75   : > { %3001 = vmatpush3.bf16.msra.mxu1 %v3363_v7  ;;  %2982 = vmatprep.subr.bf16.mxu0 %v3364_v8  ;;  %v429_v53 = vsel %vm403_vm0, %v419_v41, %v428_v47  ;;  %v357_v7 = vld [vmem:[%s3897_s29 + $0x8] sm:$0xe]  ;;  %v3398_v23 = vld [vmem:[#allocation7 + $0x120] sm:$0xff]   ;;  %v3400_v25 = vld [vmem:[#allocation7 + $0x110] sm:$0xff]   ;;  %v3702_v41 = vmov 0   ;;  %s2481_s29 = scalar_lea.sflag [#allocation6], %s3893_s19  ;;  %p3624_p12 = pnand %p3623_p7, %p4089_p1 }
  0x76   : > { %3002 = vmatprep.subr.bf16.mxu1 %v3365_v9  ;;  %2990 = vmatprep.mubr.bf16.mxu0 %v420_v45  ;;  %v789_v59 = vsel %vm777_vm2, %v784_v54, %v788_v55  ;;  %v792_v18 = vor.u32 %v790_v2, %v788_v55  ;;  %v3401_v26 = vld [vmem:[#allocation7 + $0x108] sm:$0xff]   ;;  %v3402_v27 = vld [vmem:[#allocation7 + $0x100] sm:$0xff]   ;;  %v3404_v29 = vld [vmem:[#allocation9 + $0x38] sm:$0xff]   ;;  %343 = vst [vmem:[#allocation2 + $0x4] sm:$0xf] %v3702_v41  ;;  %s3626_s9 = sshll.u32 %s3703_s28, 4  ;;  %s3627_s9 = int_to_ptr.vmem [resolvable:$false] %s3626_s9 }
  0x77   : > { %v3405_v30 = vld [vmem:[#allocation9 + $0x78] sm:$0xff]   ;;  %v3406_v31 = vld [vmem:[#allocation9 + $0x30] sm:$0xff]   ;;  %v3409_v34 = vld [vmem:[#allocation9 + $0x68] sm:$0xff]   ;;  %344 = vst [vmem:[#allocation2 + $0x18] sm:$0xf] %v3702_v41  ;;  %p3625_p9 = pneg %p3624_p12  ;;  %s3628_s10 = scalar_lea.vmem %s3627_s9, 512 }
  0x78   : > { %2983 = vmatpush3.bf16.msra.mxu0 %v3364_v8  ;;  %v3386_v8 = vld [vmem:[#allocation7 + $0x90] sm:$0xff]   ;;  %v3410_v35 = vld [vmem:[#allocation9 + $0x20] sm:$0xff]   ;;  %v3412_v37 = vld [vmem:[#allocation9 + $0x18] sm:$0xff]   ;;  %347 = vst [vmem:[#allocation3 + $0x4] sm:$0xf] %v3702_v41  ;;  %p3629_p13 = scmp.lt.s32.totalorder %s4011_s22, %s3627_s9  ;;  %p3630_p0 = scmp.lt.s32.totalorder %s3628_s10, %s3622_s30 }
  0x79   : > { %3003 = vmatpush3.bf16.msra.mxu1 %v3365_v9  ;;  %2984 = vmatprep.subr.bf16.mxu0 %v3366_v10  ;;  %v2650_v9 = vcombine.low %v357_v7, %v3914_v14  ;;  %v3394_v14 = vld [vmem:[#allocation7 + $0x138] sm:$0xff]   ;;  %v3411_v36 = vld [vmem:[#allocation9 + $0x60] sm:$0xff]   ;;  %v3414_v39 = vld [vmem:[#allocation9 + $0x10] sm:$0xff]   ;;  %348 = vst [vmem:[#allocation3 + $0x18] sm:$0xf] %v3702_v41 }
  0x7a   : > { %3004 = vmatprep.subr.bf16.mxu1 %v3367_v11  ;;  %v3413_v38 = vld [vmem:[#allocation9 + $0x58] sm:$0xff]   ;;  %v3415_v40 = vld [vmem:[#allocation9 + $0x50] sm:$0xff]   ;;  %v3418_v44 = vld [vmem:[#allocation9] sm:$0xff]   ;;  %p3631_p2 = por %p3630_p0, %p3629_p13 }
  0x7b   : > { %v921_v12 = vrot.slane %v2650_v9, 1  ;;  %v3419_v45 = vld [vmem:[#allocation9 + $0x40] sm:$0xff]   ;;  %v3949_v47 = vld [vmem:[#allocation9 + $0xb8] sm:$0xff]  }
  0x7c   : > { %2985 = vmatpush3.bf16.msra.mxu0 %v3366_v10  ;;  %v3387_v10 = vld [vmem:[#allocation7 + $0xd0] sm:$0xff]   ;;  %p3632_p10 = pnand %p3631_p2, %p3625_p9 }
  0x7d   : > { %3005 = vmatpush3.bf16.msra.mxu1 %v3367_v11  ;;  %2986 = vmatprep.subr.bf16.mxu0 %v3368_v20  ;;  %v796_v11 = vrot.slane %v794_v5, 1  ;;  %v923_v21 = vsel %vm920_vm3, %v921_v12, %v922_v4 }
  0x7e   : > { %3006 = vmatprep.subr.bf16.mxu1 %v3369_v28 }
  0x80   : > { %2987 = vmatpush3.bf16.msra.mxu0 %v3368_v20  ;;  %v797_v20 = vsel %vm777_vm2, %v792_v18, %v796_v11  ;;  %v2659_v11 = vld [vmem:[%s4063_s4] ss:$0 sm:$0xff] }
  0x81   : > { %3007 = vmatpush3.bf16.msra.mxu1 %v3369_v28  ;;  %2988 = vmatprep.subr.bf16.mxu0 %v3370_v33  ;;  %v925_v28 = vsel %vm920_vm3, %v922_v4, %v924_v6 }
  0x82   : > { %3008 = vmatprep.subr.bf16.mxu1 %v3371_v43 }
  0x84   : > { %2989 = vmatpush3.bf16.msra.mxu0 %v3370_v33  ;;  %v3408_v33 = vld [vmem:[#allocation9 + $0x28] sm:$0xff]  }
  0x85   : > { %3009 = vmatpush3.bf16.msra.mxu1 %v3371_v43  ;;  %3014 = vmatprep.subr.bf16.mxu0 %v3376_v46  ;;  %v3417_v43 = vld [vmem:[#allocation9 + $0x48] sm:$0xff]  }
  0x86   : > { %3034 = vmatprep.subr.bf16.mxu1 %v3377_v52 }
  0x87   : > { %2991 = vmatmul.mubr.bf16.vlgmr.msra.gmra.mxu0 %v429_v53 }
  0x88   : > { %3011 = vmatmul.mubr.bf16.vlgmr.msra.gmra.mxu1 %v537_v56  ;;  %3015 = vmatpush3.bf16.msra.mxu0 %v3376_v46  ;;  %v3946_v46 = vld [vmem:[#allocation9 + $0xf8] sm:$0xff]  }
  0x89   : > { %3035 = vmatpush3.bf16.msra.mxu1 %v3377_v52  ;;  %3016 = vmatprep.subr.bf16.mxu0 %v3378_v57 }
  0x8a   : > { %3036 = vmatprep.subr.bf16.mxu1 %v3379_v58  ;;  %3030 = vmatprep.mubr.bf16.mxu0 %v2631_v32  ;;  %v3407_v32 = vld [vmem:[#allocation9 + $0x70] sm:$0xff]  }
  0x8b   : > { %3050 = vmatprep.mubr.bf16.mxu1 %v789_v59 }
  0x8c   : > { %3017 = vmatpush3.bf16.msra.mxu0 %v3378_v57 }
  0x8d   : > { %3037 = vmatpush3.bf16.msra.mxu1 %v3379_v58  ;;  %3018 = vmatprep.subr.bf16.mxu0 %v3380_v60 }
  0x8e   : > { %3038 = vmatprep.subr.bf16.mxu1 %v3381_v61 }
  0x90   : > { %3019 = vmatpush3.bf16.msra.mxu0 %v3380_v60 }
  0x91   : > { %3039 = vmatpush3.bf16.msra.mxu1 %v3381_v61  ;;  %3020 = vmatprep.subr.bf16.mxu0 %v3382_v63 }
  0x92   : > { %3040 = vmatprep.subr.bf16.mxu1 %v3383_v0 }
  0x94   : > { %3021 = vmatpush3.bf16.msra.mxu0 %v3382_v63 }
  0x95   : > { %3041 = vmatpush3.bf16.msra.mxu1 %v3383_v0  ;;  %3022 = vmatprep.subr.bf16.mxu0 %v3384_v1 }
  0x96   : > { %3042 = vmatprep.subr.bf16.mxu1 %v3385_v3 }
  0x98   : > { %3023 = vmatpush3.bf16.msra.mxu0 %v3384_v1 }
  0x99   : > { %3043 = vmatpush3.bf16.msra.mxu1 %v3385_v3  ;;  %3024 = vmatprep.subr.bf16.mxu0 %v3386_v8 }
  0x9a   : > { %3044 = vmatprep.subr.bf16.mxu1 %v3387_v10 }
  0x9c   : > { %3025 = vmatpush3.bf16.msra.mxu0 %v3386_v8 }
  0x9d   : > { %3045 = vmatpush3.bf16.msra.mxu1 %v3387_v10  ;;  %3026 = vmatprep.subr.bf16.mxu0 %v3388_v13 }
  0x9e   : > { %3046 = vmatprep.subr.bf16.mxu1 %v3389_v15 }
  0xa0   : > { %3027 = vmatpush3.bf16.msra.mxu0 %v3388_v13 }
  0xa1   : > { %3047 = vmatpush3.bf16.msra.mxu1 %v3389_v15  ;;  %3028 = vmatprep.subr.bf16.mxu0 %v3390_v16 }
  0xa2   : > { %3048 = vmatprep.subr.bf16.mxu1 %v3391_v17 }
  0xa4   : > { %3029 = vmatpush3.bf16.msra.mxu0 %v3390_v16 }
  0xa5   : > { %3049 = vmatpush3.bf16.msra.mxu1 %v3391_v17  ;;  %3054 = vmatprep.subr.bf16.mxu0 %v3394_v14 }
  0xa6   : > { %3074 = vmatprep.subr.bf16.mxu1 %v3405_v30 }
  0xa7   : > { %3031 = vmatmul.mubr.bf16.vlgmr.msra.gmra.mxu0 %v3922_v42  ;;  %v3416_v42 = vld [vmem:[#allocation9 + $0x8] sm:$0xff]  }
  0xa8   : > { %3055 = vmatpush3.bf16.msra.mxu0 %v3394_v14  ;;  %3051 = vmatmul.mubr.bf16.vlgmr.msra.gmra.mxu1 %v797_v20 }
  0xa9   : > { %3056 = vmatprep.subr.bf16.mxu0 %v3396_v19  ;;  %3070 = vmatprep.mubr.bf16.mxu0 %v923_v21 }
  0xaa   : > { %3075 = vmatpush3.bf16.msra.mxu1 %v3405_v30 }
  0xab   : > { %3076 = vmatprep.subr.bf16.mxu1 %v3407_v32 }
  0xac   : > { %3057 = vmatpush3.bf16.msra.mxu0 %v3396_v19 }
  0xad   : > { %3058 = vmatprep.subr.bf16.mxu0 %v3397_v22 }
  0xae   : > { %3077 = vmatpush3.bf16.msra.mxu1 %v3407_v32 }
  0xaf   : > { %3078 = vmatprep.subr.bf16.mxu1 %v3409_v34 }
  0xb0   : > { %3059 = vmatpush3.bf16.msra.mxu0 %v3397_v22 }
  0xb1   : > { %3060 = vmatprep.subr.bf16.mxu0 %v3398_v23 }
  0xb2   : > { %3079 = vmatpush3.bf16.msra.mxu1 %v3409_v34 }
  0xb3   : > { %3080 = vmatprep.subr.bf16.mxu1 %v3411_v36 }
  0xb4   : > { %3061 = vmatpush3.bf16.msra.mxu0 %v3398_v23 }
  0xb5   : > { %3062 = vmatprep.subr.bf16.mxu0 %v3399_v24 }
  0xb6   : > { %3081 = vmatpush3.bf16.msra.mxu1 %v3411_v36 }
  0xb7   : > { %3082 = vmatprep.subr.bf16.mxu1 %v3413_v38 }
  0xb8   : > { %3063 = vmatpush3.bf16.msra.mxu0 %v3399_v24 }
  0xb9   : > { %3064 = vmatprep.subr.bf16.mxu0 %v3400_v25 }
  0xba   : > { %3083 = vmatpush3.bf16.msra.mxu1 %v3413_v38 }
  0xbb   : > { %3084 = vmatprep.subr.bf16.mxu1 %v3415_v40 }
  0xbc   : > { %3065 = vmatpush3.bf16.msra.mxu0 %v3400_v25 }
  0xbd   : > { %3066 = vmatprep.subr.bf16.mxu0 %v3401_v26 }
  0xbe   : > { %3085 = vmatpush3.bf16.msra.mxu1 %v3415_v40 }
  0xbf   : > { %3086 = vmatprep.subr.bf16.mxu1 %v3417_v43 }
  0xc0   : > { %3067 = vmatpush3.bf16.msra.mxu0 %v3401_v26 }
  0xc1   : > { %3068 = vmatprep.subr.bf16.mxu0 %v3402_v27 }
  0xc2   : > { %3087 = vmatpush3.bf16.msra.mxu1 %v3417_v43 }
  0xc3   : > { %3088 = vmatprep.subr.bf16.mxu1 %v3419_v45 }
  0xc4   : > { %3069 = vmatpush3.bf16.msra.mxu0 %v3402_v27 }
  0xc5   : > { %3094 = vmatprep.subr.bf16.mxu0 %v3404_v29 }
  0xc6   : > { %3089 = vmatpush3.bf16.msra.mxu1 %v3419_v45 }
  0xc7   : > { %3071 = vmatmul.mubr.bf16.vlgmr.msra.gmra.mxu0 %v925_v28  ;;  %3114 = vmatprep.subr.bf16.mxu1 %v3949_v47 }
  0xc8   : > { %3095 = vmatpush3.bf16.msra.mxu0 %v3404_v29 }
  0xc9   : > { %3096 = vmatprep.subr.bf16.mxu0 %v3406_v31 }
  0xcc   : > { %3097 = vmatpush3.bf16.msra.mxu0 %v3406_v31  ;;  %v1064_v31 = vld [vmem:[#allocation2 + $0x4] sm:$0x8] }
  0xcd   : > { %3098 = vmatprep.subr.bf16.mxu0 %v3408_v33 }
  0xd0   : > { %3099 = vmatpush3.bf16.msra.mxu0 %v3408_v33 }
  0xd1   : > { %3100 = vmatprep.subr.bf16.mxu0 %v3410_v35 }
  0xd4   : > { %3101 = vmatpush3.bf16.msra.mxu0 %v3410_v35 }
  0xd5   : > { %3102 = vmatprep.subr.bf16.mxu0 %v3412_v37 }
  0xd8   : > { %3103 = vmatpush3.bf16.msra.mxu0 %v3412_v37 }
  0xd9   : > { %3104 = vmatprep.subr.bf16.mxu0 %v3414_v39 }
  0xdc   : > { %3105 = vmatpush3.bf16.msra.mxu0 %v3414_v39 }
  0xdd   : > { %3106 = vmatprep.subr.bf16.mxu0 %v3416_v42 }
  0xe0   : > { %3107 = vmatpush3.bf16.msra.mxu0 %v3416_v42 }
  0xe1   : > { %3108 = vmatprep.subr.bf16.mxu0 %v3418_v44 }
  0xe4   : > { %3109 = vmatpush3.bf16.msra.mxu0 %v3418_v44 }
  0xe5   : > { %3134 = vmatprep.subr.bf16.mxu0 %v3946_v46 }
 0x147   : > { %v2992_v48 = vpop.f32.mrf.mxu0 }
 0x148   : > { %v3012_v49 = vpop.f32.mrf.mxu1 }
 0x149   : > { %v514_v50 = vpop.f32.mrf.mxu0  ;;  %v631_v59 = vadd.f32 %v3012_v49, %v2992_v48 }
 0x14a   : > { %v622_v51 = vpop.f32.mrf.mxu1 }
 0x14b   : > { %v2993_v52 = vpop.f32.mrf.mxu0  ;;  %v623_v62 = vadd.f32 %v622_v51, %v514_v50 }
 0x14c   : > { %v3013_v53 = vpop.f32.mrf.mxu1 }
 0x14d   : > { %v517_v54 = vpop.f32.mrf.mxu0  ;;  %v634_v0 = vadd.f32 %v3013_v53, %v2993_v52 }
 0x14e   : > { %v625_v56 = vpop.f32.mrf.mxu1 }
 0x14f   : > { %v626_v4 = vadd.f32 %v625_v56, %v517_v54 }
 0x167   : > { %v3032_v55 = vpop.f32.mrf.mxu0 }
 0x168   : > { %v3052_v58 = vpop.f32.mrf.mxu1  ;;  %v756_v63 = vadd.f32 %v3032_v55, %v631_v59  ;;  %v3426_v59 = vld [vmem:[#allocation9 + $0xf0] sm:$0xff]  }
 0x169   : > { %v739_v57 = vpop.f32.mrf.mxu0 }
 0x16a   : > { %v882_v61 = vpop.f32.mrf.mxu1  ;;  %v754_v1 = vadd.f32 %v739_v57, %v623_v62  ;;  %v899_v5 = vadd.f32 %v3052_v58, %v756_v63 }
 0x16b   : > { %v3033_v60 = vpop.f32.mrf.mxu0 }
 0x16c   : > { %v3053_v3 = vpop.f32.mrf.mxu1  ;;  %v757_v6 = vadd.f32 %v3033_v60, %v634_v0  ;;  %v897_v8 = vadd.f32 %v882_v61, %v754_v1 }
 0x16d   : > { %v742_v2 = vpop.f32.mrf.mxu0 }
 0x16e   : > { %v755_v9 = vadd.f32 %v742_v2, %v626_v4  ;;  %v885_v12 = vpop.f32.mrf.mxu1  ;;  %v900_v15 = vadd.f32 %v3053_v3, %v757_v6 }
 0x170   : > { %v898_v18 = vadd.f32 %v885_v12, %v755_v9  ;;  %v3429_v9 = vld [vmem:[#allocation9 + $0xb0] sm:$0xff]   ;;  %v3431_v12 = vld [vmem:[#allocation9 + $0xa8] sm:$0xff]  }
 0x187   : > { %v3072_v7 = vpop.f32.mrf.mxu0 }
 0x188   : > { %v1027_v10 = vadd.f32 %v3072_v7, %v899_v5 }
 0x189   : > { %v1010_v13 = vpop.f32.mrf.mxu0 }
 0x18a   : > { %v1025_v16 = vadd.f32 %v1010_v13, %v897_v8  ;;  %v1038_v17 = vadd.f32 %v2659_v11, %v1027_v10  ;;  %v3430_v10 = vld [vmem:[#allocation9 + $0xe8] sm:$0xff]   ;;  %v3434_v13 = vld [vmem:[#allocation9 + $0xd8] sm:$0xff]  }
 0x18b   : > { %v3073_v14 = vpop.f32.mrf.mxu0 }
 0x18c   : > { %v1028_v19 = vadd.f32 %v3073_v14, %v900_v15  ;;  %v1036_v20 = vadd.f32 %v2659_v11, %v1025_v16  ;;  %3500 = vtanh.f32 %v1038_v17  ;;  %v3433_v15 = vld [vmem:[#allocation9 + $0xa0] sm:$0xff]   ;;  %v3436_v16 = vld [vmem:[#allocation9 + $0xd0] sm:$0xff]   ;;  %v3435_v17 = vld [vmem:[#allocation9 + $0x98] sm:$0xff]  }
 0x18d   : > { %v1013_v21 = vpop.f32.mrf.mxu0  ;;  %v3437_v14 = vld [vmem:[#allocation9 + $0x90] sm:$0xff]  }
 0x18e   : > { %v1039_v22 = vadd.f32 %v2659_v11, %v1028_v19  ;;  %v1026_v23 = vadd.f32 %v1013_v21, %v898_v18  ;;  %v3442_v18 = vld [vmem:[#allocation2 + $0x18] ss:$0 sps:$4 sm:$0x11]   ;;  %v3440_v19 = vld [vmem:[#allocation9 + $0xc0] sm:$0xff]  }
 0x18f   : > { %v1505_v21 = vshll.u32 %v3442_v18, 16 }
 0x190   : > { %3502 = vtanh.f32 %v1039_v22  ;;  %v1037_v24 = vadd.f32 %v2659_v11, %v1026_v23 }
 0x191   : > { %3504 = vtanh.f32 %v1036_v20  ;;  %v3439_v20 = vld [vmem:[#allocation9 + $0x88] sm:$0xff]  }
 0x192   : > { %3506 = vtanh.f32 %v1037_v24  ;;  %v3441_v24 = vld [vmem:[#allocation9 + $0x80] sm:$0xff]  }
 0x199   : > { %v3501_v25 = vpop.eup %3500 }
 0x19d   : > { %v3503_v26 = vpop.eup %3502 }
 0x19e   : > { %v3505_v27 = vpop.eup %3504  ;;  %v2797_v28 = vpack.c.bf16 %v3503_v26, %v3501_v25  ;;  %v1507_v26 = vrot.slane %v1505_v21, 1 }
 0x19f   : > { %v3507_v29 = vpop.eup %3506 }
 0x1a0   : > { %2820 = vst [vmem:[#allocation2 + $0x10] sm:$0xff] %v2797_v28   ;;  %v2792_v30 = vpack.c.bf16 %v3507_v29, %v3505_v27  ;;  %v3443_v29 = vld [vmem:[#allocation9 + $0x138] sm:$0xff]  }
 0x1a2   : > { %2819 = vst [vmem:[#allocation2 + $0x8] sm:$0xff] %v2792_v30  }
 0x1a7   : > { %v1067_v32 = vld [vmem:[#allocation2 + $0x10] sm:$0xf]  ;;  %v1069_v33 = vld [vmem:[#allocation2 + $0x14] sm:$0xf] }
 0x1a8   : > { %v3424_v34 = vld [vmem:[#allocation2 + $0x14] ss:$0 sps:$4 sm:$0x77]   ;;  %v2666_v35 = vcombine.low %v1069_v33, %v1069_v33  ;;  %v3957_v38 = vcombine.low %v1067_v32, %v1069_v33 }
 0x1a9   : > { %v1065_v36 = vld [vmem:[#allocation2 + $0x8] sm:$0xf]  ;;  %v3955_v37 = vld [vmem:[#allocation2 + $0xc] sm:$0xf]  ;;  %v1248_v42 = vrot.slane %v3424_v34, 3 }
 0x1aa   : > { %v2664_v39 = vcombine.low %v1064_v31, %v1065_v36  ;;  %v2665_v40 = vcombine.low %v3955_v37, %v1067_v32  ;;  %v2684_v41 = vcombine.low %v1065_v36, %v3955_v37  ;;  %v1135_v43 = vshrl.u32 %v2666_v35, 16  ;;  %v1071_v23 = vld [vmem:[#allocation2 + $0x8] sm:$0xe]  ;;  %v3445_v32 = vld [vmem:[#allocation9 + $0x130] sm:$0xff]   ;;  %v3448_v36 = vld [vmem:[#allocation9 + $0x118] sm:$0xff]  }
 0x1ab   : > { %v1138_v44 = vshll.u32 %v2666_v35, 16  ;;  %v1497_v54 = vshll.u32 %v3957_v38, 16  ;;  %v1501_v22 = vshrl.u32 %v3957_v38, 16  ;;  %v2703_v27 = vcombine.low %v1071_v23, %v3955_v37  ;;  %v3446_v34 = vld [vmem:[#allocation9 + $0x128] sm:$0xff]   ;;  %v3447_v35 = vld [vmem:[#allocation9 + $0x120] sm:$0xff]   ;;  %v3449_v37 = vld [vmem:[#allocation9 + $0x110] sm:$0xff]  }
 0x1ac   : > { %v1245_v45 = vrot.slane %v2664_v39, 3  ;;  %v1246_v48 = vrot.slane %v2665_v40, 3  ;;  %v1118_v49 = vshrl.u32 %v2664_v39, 16  ;;  %v1121_v50 = vshll.u32 %v2664_v39, 16  ;;  %v3450_v39 = vld [vmem:[#allocation9 + $0x108] sm:$0xff]  }
 0x1ad   : > { %v1126_v51 = vshrl.u32 %v2665_v40, 16  ;;  %v1129_v52 = vshll.u32 %v2665_v40, 16  ;;  %v1492_v53 = vshll.u32 %v2684_v41, 16  ;;  %v1490_v62 = vshrl.u32 %v2684_v41, 16 }
 0x1ae   : > { %v1247_v55 = vsel %vm532_vm1, %v1245_v45, %v1246_v48  ;;  %v1249_v56 = vsel %vm532_vm1, %v1246_v48, %v1248_v42  ;;  %v1120_v57 = vrot.slane %v1118_v49, 3  ;;  %v1123_v58 = vrot.slane %v1121_v50, 4  ;;  %v3452_v42 = vld [vmem:[#allocation10 + $0x38] sm:$0xff]   ;;  %v3455_v45 = vld [vmem:[#allocation10 + $0x70] sm:$0xff]   ;;  %v3456_v48 = vld [vmem:[#allocation10 + $0x28] sm:$0xff]  }
 0x1af   : > { %3110 = vmatprep.mubr.bf16.mxu0 %v1247_v55  ;;  %v1128_v60 = vrot.slane %v1126_v51, 3  ;;  %v1131_v61 = vrot.slane %v1129_v52, 4  ;;  %v1494_v63 = vrot.slane %v1492_v53, 1  ;;  %v1137_v1 = vrot.slane %v1135_v43, 3  ;;  %v3453_v43 = vld [vmem:[#allocation10 + $0x78] sm:$0xff]   ;;  %v3457_v49 = vld [vmem:[#allocation10 + $0x68] sm:$0xff]  }
 0x1b0   : > { %3111 = vmatmul.mubr.bf16.vlgmr.msra.gmra.mxu0 %v1249_v56  ;;  %v1124_v0 = vor.u32 %v1123_v58, %v1120_v57  ;;  %v1140_v2 = vrot.slane %v1138_v44, 4  ;;  %v1499_v5 = vrot.slane %v1497_v54, 1  ;;  %v1631_v30 = vrot.slane %v2703_v27, 1  ;;  %v3454_v44 = vld [vmem:[#allocation10 + $0x30] sm:$0xff]   ;;  %v3458_v50 = vld [vmem:[#allocation10 + $0x20] sm:$0xff]   ;;  %v3460_v52 = vld [vmem:[#allocation10 + $0x18] sm:$0xff]  }
 0x1b1   : > { %3135 = vmatpush3.bf16.msra.mxu0 %v3946_v46  ;;  %v1132_v3 = vor.u32 %v1131_v61, %v1128_v60  ;;  %v1495_v4 = vor.u32 %v1494_v63, %v1490_v62  ;;  %v3432_v46 = vld [vmem:[#allocation9 + $0xe0] sm:$0xff]   ;;  %v1632_v31 = vrot.slane %v3957_v38, 1  ;;  %v1634_v40 = vrot.slane %v3442_v18, 1  ;;  %v3461_v53 = vld [vmem:[#allocation10 + $0x58] sm:$0xff]   ;;  %v3462_v54 = vld [vmem:[#allocation10 + $0x10] sm:$0xff]  }
 0x1b2   : > { %3136 = vmatprep.subr.bf16.mxu0 %v3426_v59  ;;  %v1141_v6 = vor.u32 %v1140_v2, %v1137_v1  ;;  %v1503_v25 = vor.u32 %v1501_v22, %v1499_v5  ;;  %v3459_v51 = vld [vmem:[#allocation10 + $0x60] sm:$0xff]   ;;  %v3463_v55 = vld [vmem:[#allocation10 + $0x50] sm:$0xff]   ;;  %v3464_v56 = vld [vmem:[#allocation10 + $0x8] sm:$0xff]  }
 0x1b3   : > { %v1133_v7 = vsel %vm403_vm0, %v1124_v0, %v1132_v3  ;;  %v1500_v8 = vsel %vm777_vm2, %v1495_v4, %v1499_v5  ;;  %v1633_v33 = vsel %vm920_vm3, %v1631_v30, %v1632_v31  ;;  %v3465_v57 = vld [vmem:[#allocation10 + $0x48] sm:$0xff]   ;;  %v3466_v58 = vld [vmem:[#allocation10] sm:$0xff]   ;;  %v3976_v60 = vld [vmem:[#allocation10 + $0xf8] sm:$0xff]  }
 0x1b4   : > { %3090 = vmatprep.mubr.bf16.mxu1 %v1133_v7  ;;  %3150 = vmatprep.mubr.bf16.mxu0 %v1500_v8  ;;  %v1142_v11 = vsel %vm403_vm0, %v1132_v3, %v1141_v6  ;;  %v1508_v28 = vsel %vm777_vm2, %v1503_v25, %v1507_v26  ;;  %v3979_v61 = vld [vmem:[#allocation10 + $0xb8] sm:$0xff]   ;;  %v2712_v22 = vld [vmem:[%s4064_s5] ss:$0 sm:$0xff] }
 0x1b5   : > { %3091 = vmatmul.mubr.bf16.vlgmr.msra.gmra.mxu1 %v1142_v11  ;;  %3137 = vmatpush3.bf16.msra.mxu0 %v3426_v59  ;;  %v3467_v59 = vld [vmem:[#allocation10 + $0x40] sm:$0xff]  }
 0x1b6   : > { %3115 = vmatpush3.bf16.msra.mxu1 %v3949_v47  ;;  %3130 = vmatprep.mubr.bf16.mxu1 %v2684_v41  ;;  %v3438_v47 = vld [vmem:[#allocation9 + $0xc8] sm:$0xff]   ;;  %v1635_v41 = vsel %vm920_vm3, %v1632_v31, %v1634_v40 }
 0x1b7   : > { %3116 = vmatprep.subr.bf16.mxu1 %v3429_v9  ;;  %3138 = vmatprep.subr.bf16.mxu0 %v3430_v10 }
 0x1b9   : > { %3139 = vmatpush3.bf16.msra.mxu0 %v3430_v10 }
 0x1ba   : > { %3117 = vmatpush3.bf16.msra.mxu1 %v3429_v9  ;;  %3140 = vmatprep.subr.bf16.mxu0 %v3432_v46 }
 0x1bb   : > { %3118 = vmatprep.subr.bf16.mxu1 %v3431_v12 }
 0x1bd   : > { %3141 = vmatpush3.bf16.msra.mxu0 %v3432_v46 }
 0x1be   : > { %3119 = vmatpush3.bf16.msra.mxu1 %v3431_v12  ;;  %3142 = vmatprep.subr.bf16.mxu0 %v3434_v13 }
 0x1bf   : > { %3120 = vmatprep.subr.bf16.mxu1 %v3433_v15 }
 0x1c1   : > { %3143 = vmatpush3.bf16.msra.mxu0 %v3434_v13 }
 0x1c2   : > { %3121 = vmatpush3.bf16.msra.mxu1 %v3433_v15  ;;  %3144 = vmatprep.subr.bf16.mxu0 %v3436_v16 }
 0x1c3   : > { %3122 = vmatprep.subr.bf16.mxu1 %v3435_v17 }
 0x1c5   : > { %3145 = vmatpush3.bf16.msra.mxu0 %v3436_v16 }
 0x1c6   : > { %3123 = vmatpush3.bf16.msra.mxu1 %v3435_v17  ;;  %3146 = vmatprep.subr.bf16.mxu0 %v3438_v47 }
 0x1c7   : > { %3124 = vmatprep.subr.bf16.mxu1 %v3437_v14 }
 0x1c9   : > { %3147 = vmatpush3.bf16.msra.mxu0 %v3438_v47 }
 0x1ca   : > { %3125 = vmatpush3.bf16.msra.mxu1 %v3437_v14  ;;  %3148 = vmatprep.subr.bf16.mxu0 %v3440_v19 }
 0x1cb   : > { %3126 = vmatprep.subr.bf16.mxu1 %v3439_v20 }
 0x1cd   : > { %3149 = vmatpush3.bf16.msra.mxu0 %v3440_v19 }
 0x1ce   : > { %3127 = vmatpush3.bf16.msra.mxu1 %v3439_v20  ;;  %3174 = vmatprep.subr.bf16.mxu0 %v3453_v43 }
 0x1cf   : > { %3128 = vmatprep.subr.bf16.mxu1 %v3441_v24 }
 0x1d0   : > { %3151 = vmatmul.mubr.bf16.vlgmr.msra.gmra.mxu0 %v1508_v28 }
 0x1d1   : > { %3175 = vmatpush3.bf16.msra.mxu0 %v3453_v43  ;;  %v1774_v43 = vld [vmem:[#allocation3 + $0x4] sm:$0x8] }
 0x1d2   : > { %3129 = vmatpush3.bf16.msra.mxu1 %v3441_v24  ;;  %3176 = vmatprep.subr.bf16.mxu0 %v3455_v45 }
 0x1d3   : > { %3154 = vmatprep.subr.bf16.mxu1 %v3443_v29 }
 0x1d5   : > { %3131 = vmatmul.mubr.bf16.vlgmr.msra.gmra.mxu1 %v3957_v38  ;;  %v3451_v38 = vld [vmem:[#allocation9 + $0x100] sm:$0xff]   ;;  %3177 = vmatpush3.bf16.msra.mxu0 %v3455_v45 }
 0x1d6   : > { %3155 = vmatpush3.bf16.msra.mxu1 %v3443_v29  ;;  %3170 = vmatprep.mubr.bf16.mxu1 %v1633_v33 }
 0x1d7   : > { %3156 = vmatprep.subr.bf16.mxu1 %v3445_v32  ;;  %3178 = vmatprep.subr.bf16.mxu0 %v3457_v49 }
 0x1d9   : > { %3179 = vmatpush3.bf16.msra.mxu0 %v3457_v49 }
 0x1da   : > { %3157 = vmatpush3.bf16.msra.mxu1 %v3445_v32  ;;  %3180 = vmatprep.subr.bf16.mxu0 %v3459_v51 }
 0x1db   : > { %3158 = vmatprep.subr.bf16.mxu1 %v3446_v34 }
 0x1dd   : > { %3181 = vmatpush3.bf16.msra.mxu0 %v3459_v51 }
 0x1de   : > { %3159 = vmatpush3.bf16.msra.mxu1 %v3446_v34  ;;  %3182 = vmatprep.subr.bf16.mxu0 %v3461_v53 }
 0x1df   : > { %3160 = vmatprep.subr.bf16.mxu1 %v3447_v35 }
 0x1e1   : > { %3183 = vmatpush3.bf16.msra.mxu0 %v3461_v53 }
 0x1e2   : > { %3161 = vmatpush3.bf16.msra.mxu1 %v3447_v35  ;;  %3184 = vmatprep.subr.bf16.mxu0 %v3463_v55 }
 0x1e3   : > { %3162 = vmatprep.subr.bf16.mxu1 %v3448_v36 }
 0x1e5   : > { %3185 = vmatpush3.bf16.msra.mxu0 %v3463_v55 }
 0x1e6   : > { %3163 = vmatpush3.bf16.msra.mxu1 %v3448_v36  ;;  %3186 = vmatprep.subr.bf16.mxu0 %v3465_v57 }
 0x1e7   : > { %3164 = vmatprep.subr.bf16.mxu1 %v3449_v37 }
 0x1e9   : > { %3187 = vmatpush3.bf16.msra.mxu0 %v3465_v57 }
 0x1ea   : > { %3165 = vmatpush3.bf16.msra.mxu1 %v3449_v37  ;;  %3188 = vmatprep.subr.bf16.mxu0 %v3467_v59 }
 0x1eb   : > { %3166 = vmatprep.subr.bf16.mxu1 %v3450_v39 }
 0x1ed   : > { %3189 = vmatpush3.bf16.msra.mxu0 %v3467_v59 }
 0x1ee   : > { %3167 = vmatpush3.bf16.msra.mxu1 %v3450_v39  ;;  %3214 = vmatprep.subr.bf16.mxu0 %v3979_v61 }
 0x1ef   : > { %3168 = vmatprep.subr.bf16.mxu1 %v3451_v38 }
 0x1f2   : > { %3169 = vmatpush3.bf16.msra.mxu1 %v3451_v38 }
 0x1f3   : > { %3194 = vmatprep.subr.bf16.mxu1 %v3452_v42 }
 0x1f5   : > { %3171 = vmatmul.mubr.bf16.vlgmr.msra.gmra.mxu1 %v1635_v41 }
 0x1f6   : > { %3195 = vmatpush3.bf16.msra.mxu1 %v3452_v42 }
 0x1f7   : > { %3196 = vmatprep.subr.bf16.mxu1 %v3454_v44 }
 0x1fa   : > { %3197 = vmatpush3.bf16.msra.mxu1 %v3454_v44 }
 0x1fb   : > { %3198 = vmatprep.subr.bf16.mxu1 %v3456_v48 }
 0x1fe   : > { %3199 = vmatpush3.bf16.msra.mxu1 %v3456_v48 }
 0x1ff   : > { %3200 = vmatprep.subr.bf16.mxu1 %v3458_v50 }
 0x202   : > { %3201 = vmatpush3.bf16.msra.mxu1 %v3458_v50 }
 0x203   : > { %3202 = vmatprep.subr.bf16.mxu1 %v3460_v52 }
 0x206   : > { %3203 = vmatpush3.bf16.msra.mxu1 %v3460_v52 }
 0x207   : > { %3204 = vmatprep.subr.bf16.mxu1 %v3462_v54 }
 0x20a   : > { %3205 = vmatpush3.bf16.msra.mxu1 %v3462_v54 }
 0x20b   : > { %3206 = vmatprep.subr.bf16.mxu1 %v3464_v56 }
 0x20e   : > { %3207 = vmatpush3.bf16.msra.mxu1 %v3464_v56 }
 0x20f   : > { %3208 = vmatprep.subr.bf16.mxu1 %v3466_v58 }
 0x212   : > { %3209 = vmatpush3.bf16.msra.mxu1 %v3466_v58 }
 0x213   : > { %3234 = vmatprep.subr.bf16.mxu1 %v3976_v60 }
 0x270   : > { %v3112_v0 = vpop.f32.mrf.mxu0 }
 0x272   : > { %v1334_v2 = vpop.f32.mrf.mxu0 }
 0x274   : > { %v3113_v4 = vpop.f32.mrf.mxu0 }
 0x275   : > { %v3092_v62 = vpop.f32.mrf.mxu1 }
 0x276   : > { %v1337_v6 = vpop.f32.mrf.mxu0  ;;  %v1343_v9 = vadd.f32 %v3112_v0, %v3092_v62 }
 0x277   : > { %v1227_v63 = vpop.f32.mrf.mxu1 }
 0x278   : > { %v1335_v11 = vadd.f32 %v1334_v2, %v1227_v63 }
 0x279   : > { %v3093_v1 = vpop.f32.mrf.mxu1 }
 0x27a   : > { %v1346_v13 = vadd.f32 %v3113_v4, %v3093_v1 }
 0x27b   : > { %v1230_v3 = vpop.f32.mrf.mxu1 }
 0x27c   : > { %v1338_v17 = vadd.f32 %v1337_v6, %v1230_v3 }
 0x290   : > { %v3152_v8 = vpop.f32.mrf.mxu0 }
 0x292   : > { %v1593_v12 = vpop.f32.mrf.mxu0 }
 0x294   : > { %v3153_v18 = vpop.f32.mrf.mxu0 }
 0x295   : > { %v3132_v5 = vpop.f32.mrf.mxu1 }
 0x296   : > { %v1468_v46 = vadd.f32 %v3132_v5, %v1343_v9  ;;  %v1596_v27 = vpop.f32.mrf.mxu0  ;;  %v3474_v9 = vld [vmem:[#allocation10 + $0xf0] sm:$0xff]  }
 0x297   : > { %v1451_v7 = vpop.f32.mrf.mxu1 }
 0x298   : > { %v1466_v15 = vadd.f32 %v1451_v7, %v1335_v11  ;;  %v1610_v14 = vadd.f32 %v3152_v8, %v1468_v46 }
 0x299   : > { %v3133_v10 = vpop.f32.mrf.mxu1 }
 0x29a   : > { %v1469_v47 = vadd.f32 %v3133_v10, %v1346_v13  ;;  %v1608_v23 = vadd.f32 %v1593_v12, %v1466_v15 }
 0x29b   : > { %v1454_v16 = vpop.f32.mrf.mxu1 }
 0x29c   : > { %v1467_v20 = vadd.f32 %v1454_v16, %v1338_v17  ;;  %v1611_v26 = vadd.f32 %v3153_v18, %v1469_v47 }
 0x29e   : > { %v1609_v31 = vadd.f32 %v1596_v27, %v1467_v20  ;;  %v3484_v27 = vld [vmem:[#allocation10 + $0xd0] sm:$0xff]  }
 0x2b5   : > { %v3172_v19 = vpop.f32.mrf.mxu1 }
 0x2b6   : > { %v1737_v21 = vadd.f32 %v3172_v19, %v1610_v14 }
 0x2b7   : > { %v1720_v24 = vpop.f32.mrf.mxu1 }
 0x2b8   : > { %v1735_v25 = vadd.f32 %v1720_v24, %v1608_v23  ;;  %v1748_v28 = vadd.f32 %v2712_v22, %v1737_v21  ;;  %v3477_v21 = vld [vmem:[#allocation10 + $0xb0] sm:$0xff]   ;;  %v3479_v24 = vld [vmem:[#allocation10 + $0xa8] sm:$0xff]  }
 0x2b9   : > { %v3173_v29 = vpop.f32.mrf.mxu1 }
 0x2ba   : > { %v1738_v30 = vadd.f32 %v3173_v29, %v1611_v26  ;;  %v1746_v32 = vadd.f32 %v2712_v22, %v1735_v25  ;;  %3508 = vtanh.f32 %v1748_v28  ;;  %v3482_v25 = vld [vmem:[#allocation10 + $0xd8] sm:$0xff]   ;;  %v3481_v26 = vld [vmem:[#allocation10 + $0xa0] sm:$0xff]   ;;  %v3485_v29 = vld [vmem:[#allocation10 + $0x90] sm:$0xff]  }
 0x2bb   : > { %v1723_v33 = vpop.f32.mrf.mxu1  ;;  %v3483_v28 = vld [vmem:[#allocation10 + $0x98] sm:$0xff]  }
 0x2bc   : > { %v1749_v34 = vadd.f32 %v2712_v22, %v1738_v30  ;;  %v1736_v35 = vadd.f32 %v1723_v33, %v1609_v31  ;;  %v3490_v30 = vld [vmem:[#allocation3 + $0x18] ss:$0 sps:$4 sm:$0x11]   ;;  %v3488_v31 = vld [vmem:[#allocation10 + $0xc0] sm:$0xff]  }
 0x2bd   : > { %v2215_v33 = vshll.u32 %v3490_v30, 16 }
 0x2be   : > { %3510 = vtanh.f32 %v1749_v34  ;;  %v1747_v36 = vadd.f32 %v2712_v22, %v1736_v35  ;;  %v3478_v22 = vld [vmem:[#allocation10 + $0xe8] sm:$0xff]  }
 0x2bf   : > { %3512 = vtanh.f32 %v1746_v32  ;;  %v3487_v32 = vld [vmem:[#allocation10 + $0x88] sm:$0xff]  }
 0x2c0   : > { %3514 = vtanh.f32 %v1747_v36  ;;  %v3489_v36 = vld [vmem:[#allocation10 + $0x80] sm:$0xff]  }
 0x2c7   : > { %v3509_v37 = vpop.eup %3508 }
 0x2cb   : > { %v3511_v39 = vpop.eup %3510 }
 0x2cc   : > { %v3513_v38 = vpop.eup %3512  ;;  %v2807_v40 = vpack.c.bf16 %v3511_v39, %v3509_v37  ;;  %v2217_v39 = vrot.slane %v2215_v33, 1 }
 0x2cd   : > { %v3515_v41 = vpop.eup %3514 }
 0x2ce   : > { %2822 = vst [vmem:[#allocation3 + $0x10] sm:$0xff] %v2807_v40   ;;  %v2802_v42 = vpack.c.bf16 %v3515_v41, %v3513_v38  ;;  %v3491_v41 = vld [vmem:[#allocation10 + $0x138] sm:$0xff]  }
 0x2d0   : > { %2821 = vst [vmem:[#allocation3 + $0x8] sm:$0xff] %v2802_v42  }
 0x2d5   : > { %v1777_v44 = vld [vmem:[#allocation3 + $0x10] sm:$0xf]  ;;  %v1779_v45 = vld [vmem:[#allocation3 + $0x14] sm:$0xf] }
 0x2d6   : > { %v3472_v48 = vld [vmem:[#allocation3 + $0x14] ss:$0 sps:$4 sm:$0x77]   ;;  %v2719_v49 = vcombine.low %v1779_v45, %v1779_v45  ;;  %v3987_v52 = vcombine.low %v1777_v44, %v1779_v45 }
 0x2d7   : > { %v1775_v50 = vld [vmem:[#allocation3 + $0x8] sm:$0xf]  ;;  %v3985_v51 = vld [vmem:[#allocation3 + $0xc] sm:$0xf]  ;;  %v1958_v56 = vrot.slane %v3472_v48, 3 }
 0x2d8   : > { %v2717_v53 = vcombine.low %v1774_v43, %v1775_v50  ;;  %v2718_v54 = vcombine.low %v3985_v51, %v1777_v44  ;;  %v2737_v55 = vcombine.low %v1775_v50, %v3985_v51  ;;  %v1845_v57 = vshrl.u32 %v2719_v49, 16  ;;  %v1781_v35 = vld [vmem:[#allocation3 + $0x8] sm:$0xe]  ;;  %v3493_v44 = vld [vmem:[#allocation10 + $0x130] sm:$0xff]   ;;  %v3496_v50 = vld [vmem:[#allocation10 + $0x118] sm:$0xff]  }
 0x2d9   : > { %v1848_v58 = vshll.u32 %v2719_v49, 16  ;;  %v2207_v4 = vshll.u32 %v3987_v52, 16  ;;  %v2211_v34 = vshrl.u32 %v3987_v52, 16  ;;  %v2756_v38 = vcombine.low %v1781_v35, %v3985_v51  ;;  %v3494_v48 = vld [vmem:[#allocation10 + $0x128] sm:$0xff]   ;;  %v3495_v49 = vld [vmem:[#allocation10 + $0x120] sm:$0xff]   ;;  %v3497_v51 = vld [vmem:[#allocation10 + $0x110] sm:$0xff]  }
 0x2da   : > { %v1955_v59 = vrot.slane %v2717_v53, 3  ;;  %v1956_v62 = vrot.slane %v2718_v54, 3  ;;  %v1828_v63 = vshrl.u32 %v2717_v53, 16  ;;  %v1831_v0 = vshll.u32 %v2717_v53, 16  ;;  %v3498_v53 = vld [vmem:[#allocation10 + $0x108] sm:$0xff]  }
 0x2db   : > { %v1836_v1 = vshrl.u32 %v2718_v54, 16  ;;  %v1839_v2 = vshll.u32 %v2718_v54, 16  ;;  %v2202_v3 = vshll.u32 %v2737_v55, 16  ;;  %v2200_v46 = vshrl.u32 %v2737_v55, 16 }
 0x2dc   : > { %v1957_v5 = vsel %vm532_vm1, %v1955_v59, %v1956_v62  ;;  %v1959_v6 = vsel %vm532_vm1, %v1956_v62, %v1958_v56  ;;  %v1830_v7 = vrot.slane %v1828_v63, 3  ;;  %v1833_v8 = vrot.slane %v1831_v0, 4 }
 0x2dd   : > { %3210 = vmatprep.mubr.bf16.mxu1 %v1957_v5  ;;  %v1838_v10 = vrot.slane %v1836_v1, 3  ;;  %v1841_v11 = vrot.slane %v1839_v2, 4  ;;  %v2204_v12 = vrot.slane %v2202_v3, 1  ;;  %v1847_v15 = vrot.slane %v1845_v57, 3 }
 0x2de   : > { %3211 = vmatmul.mubr.bf16.vlgmr.msra.gmra.mxu1 %v1959_v6  ;;  %v1834_v13 = vor.u32 %v1833_v8, %v1830_v7  ;;  %v1850_v16 = vrot.slane %v1848_v58, 4  ;;  %v2209_v14 = vrot.slane %v2207_v4, 1  ;;  %v2341_v42 = vrot.slane %v2756_v38, 1 }
 0x2df   : > { %3235 = vmatpush3.bf16.msra.mxu1 %v3976_v60  ;;  %v1842_v17 = vor.u32 %v1841_v11, %v1838_v10  ;;  %v2205_v47 = vor.u32 %v2204_v12, %v2200_v46  ;;  %v3480_v60 = vld [vmem:[#allocation10 + $0xe0] sm:$0xff]   ;;  %v2342_v43 = vrot.slane %v3987_v52, 1  ;;  %v2344_v54 = vrot.slane %v3490_v30, 1 }
 0x2e0   : > { %3236 = vmatprep.subr.bf16.mxu1 %v3474_v9  ;;  %v1851_v18 = vor.u32 %v1850_v16, %v1847_v15  ;;  %v2213_v37 = vor.u32 %v2211_v34, %v2209_v14 }
 0x2e1   : > { %v1843_v19 = vsel %vm403_vm0, %v1834_v13, %v1842_v17  ;;  %v2210_v20 = vsel %vm777_vm2, %v2205_v47, %v2209_v14  ;;  %v2343_v45 = vsel %vm920_vm3, %v2341_v42, %v2342_v43 }
 0x2e2   : > { %3190 = vmatprep.mubr.bf16.mxu0 %v1843_v19  ;;  %3250 = vmatprep.mubr.bf16.mxu1 %v2210_v20  ;;  %v1852_v23 = vsel %vm403_vm0, %v1842_v17, %v1851_v18  ;;  %v2218_v40 = vsel %vm777_vm2, %v2213_v37, %v2217_v39 }
 0x2e3   : > { %3191 = vmatmul.mubr.bf16.vlgmr.msra.gmra.mxu0 %v1852_v23  ;;  %3237 = vmatpush3.bf16.msra.mxu1 %v3474_v9 }
 0x2e4   : > { %3215 = vmatpush3.bf16.msra.mxu0 %v3979_v61  ;;  %3230 = vmatprep.mubr.bf16.mxu0 %v2737_v55  ;;  %v3486_v61 = vld [vmem:[#allocation10 + $0xc8] sm:$0xff]   ;;  %v2345_v55 = vsel %vm920_vm3, %v2342_v43, %v2344_v54 }
 0x2e5   : > { %3216 = vmatprep.subr.bf16.mxu0 %v3477_v21  ;;  %3238 = vmatprep.subr.bf16.mxu1 %v3478_v22 }
 0x2e7   : > { %3239 = vmatpush3.bf16.msra.mxu1 %v3478_v22  ;;  %v2765_v22 = vld [vmem:[%s4065_s6] ss:$0 sm:$0xff] }
 0x2e8   : > { %3217 = vmatpush3.bf16.msra.mxu0 %v3477_v21  ;;  %3240 = vmatprep.subr.bf16.mxu1 %v3480_v60 }
 0x2e9   : > { %3218 = vmatprep.subr.bf16.mxu0 %v3479_v24 }
 0x2eb   : > { %3241 = vmatpush3.bf16.msra.mxu1 %v3480_v60 }
 0x2ec   : > { %3219 = vmatpush3.bf16.msra.mxu0 %v3479_v24  ;;  %3242 = vmatprep.subr.bf16.mxu1 %v3482_v25 }
 0x2ed   : > { %3220 = vmatprep.subr.bf16.mxu0 %v3481_v26 }
 0x2ef   : > { %3243 = vmatpush3.bf16.msra.mxu1 %v3482_v25 }
 0x2f0   : > { %3221 = vmatpush3.bf16.msra.mxu0 %v3481_v26  ;;  %3244 = vmatprep.subr.bf16.mxu1 %v3484_v27 }
 0x2f1   : > { %3222 = vmatprep.subr.bf16.mxu0 %v3483_v28 }
 0x2f3   : > { %3245 = vmatpush3.bf16.msra.mxu1 %v3484_v27 }
 0x2f4   : > { %3223 = vmatpush3.bf16.msra.mxu0 %v3483_v28  ;;  %3246 = vmatprep.subr.bf16.mxu1 %v3486_v61 }
 0x2f5   : > { %3224 = vmatprep.subr.bf16.mxu0 %v3485_v29 }
 0x2f7   : > { %3247 = vmatpush3.bf16.msra.mxu1 %v3486_v61 }
 0x2f8   : > { %3225 = vmatpush3.bf16.msra.mxu0 %v3485_v29  ;;  %3248 = vmatprep.subr.bf16.mxu1 %v3488_v31 }
 0x2f9   : > { %3226 = vmatprep.subr.bf16.mxu0 %v3487_v32 }
 0x2fb   : > { %3249 = vmatpush3.bf16.msra.mxu1 %v3488_v31 }
 0x2fc   : > { %3227 = vmatpush3.bf16.msra.mxu0 %v3487_v32 }
 0x2fd   : > { %3228 = vmatprep.subr.bf16.mxu0 %v3489_v36 }
 0x2fe   : > { %3251 = vmatmul.mubr.bf16.vlgmr.msra.gmra.mxu1 %v2218_v40 }
 0x300   : > { %3229 = vmatpush3.bf16.msra.mxu0 %v3489_v36 }
 0x301   : > { %3254 = vmatprep.subr.bf16.mxu0 %v3491_v41 }
 0x303   : > { %3231 = vmatmul.mubr.bf16.vlgmr.msra.gmra.mxu0 %v3987_v52  ;;  %v3499_v52 = vld [vmem:[#allocation10 + $0x100] sm:$0xff]  }
 0x304   : > { %3255 = vmatpush3.bf16.msra.mxu0 %v3491_v41  ;;  %3270 = vmatprep.mubr.bf16.mxu0 %v2343_v45 }
 0x305   : > { %3256 = vmatprep.subr.bf16.mxu0 %v3493_v44 }
 0x308   : > { %3257 = vmatpush3.bf16.msra.mxu0 %v3493_v44 }
 0x309   : > { %3258 = vmatprep.subr.bf16.mxu0 %v3494_v48 }
 0x30c   : > { %3259 = vmatpush3.bf16.msra.mxu0 %v3494_v48 }
 0x30d   : > { %3260 = vmatprep.subr.bf16.mxu0 %v3495_v49 }
 0x310   : > { %3261 = vmatpush3.bf16.msra.mxu0 %v3495_v49 }
 0x311   : > { %3262 = vmatprep.subr.bf16.mxu0 %v3496_v50 }
 0x314   : > { %3263 = vmatpush3.bf16.msra.mxu0 %v3496_v50 }
 0x315   : > { %3264 = vmatprep.subr.bf16.mxu0 %v3497_v51 }
 0x318   : > { %3265 = vmatpush3.bf16.msra.mxu0 %v3497_v51 }
 0x319   : > { %3266 = vmatprep.subr.bf16.mxu0 %v3498_v53 }
 0x31c   : > { %3267 = vmatpush3.bf16.msra.mxu0 %v3498_v53 }
 0x31d   : > { %3268 = vmatprep.subr.bf16.mxu0 %v3499_v52 }
 0x320   : > { %3269 = vmatpush3.bf16.msra.mxu0 %v3499_v52 }
 0x323   : > { %3271 = vmatmul.mubr.bf16.vlgmr.msra.gmra.mxu0 %v2345_v55 }
 0x39e   : > { %v3212_v58 = vpop.f32.mrf.mxu1 }
 0x3a0   : > { %v2044_v62 = vpop.f32.mrf.mxu1 }
 0x3a2   : > { %v3213_v0 = vpop.f32.mrf.mxu1 }
 0x3a3   : > { %v3192_v56 = vpop.f32.mrf.mxu0 }
 0x3a4   : > { %v2047_v2 = vpop.f32.mrf.mxu1  ;;  %v2053_v6 = vadd.f32 %v3212_v58, %v3192_v56 }
 0x3a5   : > { %v1937_v57 = vpop.f32.mrf.mxu0 }
 0x3a6   : > { %v2045_v8 = vadd.f32 %v2044_v62, %v1937_v57 }
 0x3a7   : > { %v3193_v59 = vpop.f32.mrf.mxu0 }
 0x3a8   : > { %v2056_v9 = vadd.f32 %v3213_v0, %v3193_v59 }
 0x3a9   : > { %v1940_v63 = vpop.f32.mrf.mxu0 }
 0x3aa   : > { %v2048_v46 = vadd.f32 %v2047_v2, %v1940_v63 }
 0x3be   : > { %v3252_v4 = vpop.f32.mrf.mxu1 }
 0x3c0   : > { %v2303_v7 = vpop.f32.mrf.mxu1 }
 0x3c2   : > { %v3253_v15 = vpop.f32.mrf.mxu1 }
 0x3c3   : > { %v3232_v1 = vpop.f32.mrf.mxu0 }
 0x3c4   : > { %v2178_v10 = vadd.f32 %v3232_v1, %v2053_v6  ;;  %v2306_v21 = vpop.f32.mrf.mxu1 }
 0x3c5   : > { %v2161_v3 = vpop.f32.mrf.mxu0 }
 0x3c6   : > { %v2176_v12 = vadd.f32 %v2161_v3, %v2045_v8  ;;  %v2320_v47 = vadd.f32 %v3252_v4, %v2178_v10 }
 0x3c7   : > { %v3233_v5 = vpop.f32.mrf.mxu0 }
 0x3c8   : > { %v2179_v13 = vadd.f32 %v3233_v5, %v2056_v9  ;;  %v2318_v19 = vadd.f32 %v2303_v7, %v2176_v12 }
 0x3c9   : > { %v2164_v11 = vpop.f32.mrf.mxu0 }
 0x3ca   : > { %v2177_v17 = vadd.f32 %v2164_v11, %v2048_v46  ;;  %v2321_v20 = vadd.f32 %v3253_v15, %v2179_v13 }
 0x3cc   : > { %v2319_v25 = vadd.f32 %v2306_v21, %v2177_v17 }
 0x3e3   : > { %v3272_v16 = vpop.f32.mrf.mxu0 }
 0x3e4   : > { %v2447_v18 = vadd.f32 %v3272_v16, %v2320_v47 }
 0x3e5   : > { %v2430_v14 = vpop.f32.mrf.mxu0 }
 0x3e6   : > { %v2445_v60 = vadd.f32 %v2430_v14, %v2318_v19  ;;  %v2458_v27 = vadd.f32 %v2765_v22, %v2447_v18 }
 0x3e7   : > { %v3273_v23 = vpop.f32.mrf.mxu0 }
 0x3e8   : > { %v2448_v24 = vadd.f32 %v3273_v23, %v2321_v20  ;;  %v2456_v29 = vadd.f32 %v2765_v22, %v2445_v60 }
 0x3e9   : > { %v2433_v26 = vpop.f32.mrf.mxu0 }
 0x3ea   : > { %v2459_v28 = vadd.f32 %v2765_v22, %v2448_v24  ;;  %v2446_v61 = vadd.f32 %v2433_v26, %v2319_v25 }
 0x3ec   : > { %v2817_v30 = vpack.c.bf16 %v2459_v28, %v2458_v27  ;;  %v2457_v31 = vadd.f32 %v2765_v22, %v2446_v61 }
 0x3ee   : > { %2823 = vst [vmem:[%s340_s21 + $0x8] sm:$0xff] %v2817_v30   ;;  %v2812_v32 = vpack.c.bf16 %v2457_v31, %v2456_v29 }
 0x3f0   : > { %2813 = vst [vmem:[%s340_s21] sm:$0xff] %v2812_v32  }
 0x3f1   : > { %3635 = shalt.err (!%p3632_p10)
}
 0x3f2   : > { %s3636_s13 = scalar_lea.hbm %s4016_s16, 256  ;;  %s3640_s11 = scalar_lea.hbm %s4066_s7, 512 }
 0x3f3   : > { %p3637_p6 = scmp.ne.s32.totalorder %s4016_s16, %s3636_s13  ;;  %p3641_p3 = scmp.lt.s32.totalorder %s4016_s16, %s4066_s7 }
 0x3f4   : > { %p3642_p11 = scmp.lt.s32.totalorder %s3640_s11, %s3636_s13 }
 0x3f5   : > { %p3638_p4 = pnand %p3637_p6, %p4089_p1 }
 0x3f6   : > { %p3643_p5 = por %p3642_p11, %p3641_p3 }
 0x3f7   : > { %p3639_p8 = pneg %p3638_p4 }
 0x3f9   : > { %p3644_p7 = pnand %p3643_p5, %p3639_p8 }
 0x3fb   : > { %3647 = shalt.err (!%p3644_p7)
}
 0x3fc   : > { %s3704_s23 = smov 64   ;;  %s3705_s1 = smov 4  }
 0x3fd   : > { %3288 = dma.vmem_to_hbm [thread:$0]  (%p4089_p1), %s4011_s22, 256, %s4016_s16, %s2481_s29, %s3704_s23, %s3704_s23, %s3705_s1  }
 0x3fe PF: > { %s2509_s30 = sand.u32 1, %s3682_s24   ;;  %p4090_p12 = scmp.ne.s32.totalorder %s4075_s8, 0 }
 0x3ff   : > { %p4091_p9 = scmp.ge.s32.totalorder %s3694_s27, 2  ;;  %s2510_s28 = scalar_lea.sflag [#allocation6], %s2509_s30 }
 0x401   : > { %p3305_p13 = pnand %p4091_p9, %p4090_p12 }
 0x403   : > { %p3306_p0 = pneg %p3305_p13 }
 0x405   : > { %3677 = dma.done.wait (%p3306_p0), %s2510_s28, 256  }
 0x406   : > { %3679 = vsyncadd (%p3306_p0), %s2510_s28, 4294967040  ;;  %p22_p2 = scmp.ge.s32.totalorder %s3835_s14, 4   ;;  %s4092_s24 = smov %s3686_s25 }
 0x407   : > { %s4093_s25 = smov %s3690_s26  ;;  %s4094_s26 = smov %s3845_s17 }
 0x408   : > { %s4095_s27 = smov %s3835_s14  ;;  %24 = sbr.rel (!%p22_p2) target bundleno = 9 (0x9), region = 105 }
 0x40d   :  { %2515 = vsyncpa [#allocation5], 1 }
 0x40e   :  { %2517 = vsyncpa [#allocation5 + $0x1], 1 }
 0x40f   :  { %2518 = vsyncpa [#allocation8], 1 }
 0x410   :  { %2519 = vsyncpa [#allocation11], 1 }
 0x411   :  { %2520 = vsyncpa [#allocation6], 1 }
 0x412   :  { %2522 = vsyncpa [#allocation6 + $0x1], 1 }

</bundles_post_ra>
